<compile_context>
chip_gen: v7x
topology: tpu7x:2x2x1
jax: 0.10.0
libtpu: 0.0.40
codegen_flags: <defaults>
</compile_context>

<pallas_src>
import functools

import jax
import jax.numpy as jnp
from jax.experimental import pallas as pl
from jax.experimental.pallas import tpu as pltpu

LRELU_SLOPE = 0.2
EPS = 1e-5          # nn.InstanceNorm2d default eps
KSZ = 4             # kernel size
TM_MAX = 512        # M-tile rows for non-InstanceNorm layers


# ---------------------------------------------------------------------------
# Pallas kernel: one Conv2d(4x4, stride 2, pad 1) layer + fused epilogue
# ---------------------------------------------------------------------------
def _conv_block_kernel(taps_ref, w_ref, b_ref, o_ref, *, mode):
    """One (image, M-tile) grid step: single K-packed GEMM + fused epilogue.

    taps_ref: (1, TM, Kp)   bf16  -- K-packed im2col rows (Kp = 16*Cin padded to 128k)
    w_ref:    (Kp, Cout)    bf16  -- K-packed weights, true Cout
    b_ref:    (1, Cout)     f32
    o_ref:    (1, TM, Cout) bf16/f32
    """
    # Single lane-dense MXU GEMM, f32 accumulation; no VMEM accumulator RMW.
    y = jnp.dot(taps_ref[0], w_ref[...], preferred_element_type=jnp.float32)
    y = y + b_ref[...]                                   # f32 epilogue

    if mode == "in_lrelu":
        # InstanceNorm2d defaults: biased variance, eps=1e-5, no affine.
        # The whole image's M rows are in this block (wrapper guarantees it).
        mean = jnp.mean(y, axis=0, keepdims=True)
        ctr = y - mean
        var = jnp.mean(ctr * ctr, axis=0, keepdims=True)
        y = ctr * jax.lax.rsqrt(var + EPS)
    if mode in ("lrelu", "in_lrelu"):
        y = jnp.where(y >= 0, y, LRELU_SLOPE * y)

    o_ref[0] = y.astype(o_ref.dtype)


# ---------------------------------------------------------------------------
# Wrapper glue: K-packed im2col + pallas_call per layer
# ---------------------------------------------------------------------------
def _im2col_k_packed(x):
    """(N,H,W,C) -> (N, OH*OW, Kp) bf16 taps with K = 16*C padded to 128k.

    Tap ordering along K is (kh*4 + kw)*C + c, matching prepare_params.
    """
    n, h, w, c = x.shape
    assert h % 2 == 0 and w % 2 == 0, "k=4, s=2, p=1 conv expects even H, W"
    oh, ow = h // 2, w // 2
    xp = jnp.pad(x, ((0, 0), (1, 1), (1, 1), (0, 0)))
    taps = [xp[:, kh:kh + h - 1:2, kw:kw + w - 1:2, :]    # (N, OH, OW, C) per tap
            for kh in range(KSZ) for kw in range(KSZ)]
    t = jnp.concatenate(taps, axis=-1)                    # (N, OH, OW, 16*C)
    k = KSZ * KSZ * c
    kp = -(-k // 128) * 128
    t = t.reshape(n, oh * ow, k)
    if kp != k:
        t = jnp.pad(t, ((0, 0), (0, 0), (0, kp - k)))
    return t.astype(jnp.bfloat16), oh, ow


def conv_block(x, w_packed, b_row, *, mode, out_dtype):
    """x: (N, H, W, Cin_true) -> (N, H//2, W//2, Cout_true)."""
    n = x.shape[0]
    taps, oh, ow = _im2col_k_packed(x)
    m, kp = taps.shape[1], taps.shape[2]
    cout = w_packed.shape[1]

    if mode == "in_lrelu":
        tm = m                                   # whole image per block (per-image IN)
    else:
        tm = TM_MAX if (m > TM_MAX and m % TM_MAX == 0) else m

    kernel = functools.partial(_conv_block_kernel, mode=mode)
    out = pl.pallas_call(
        kernel,
        grid=(n, m // tm),
        in_specs=[
            pl.BlockSpec((1, tm, kp), lambda i, j: (i, j, 0)),
            pl.BlockSpec((kp, cout), lambda i, j: (0, 0)),   # constant -> stays resident
            pl.BlockSpec((1, cout), lambda i, j: (0, 0)),
        ],
        out_specs=pl.BlockSpec((1, tm, cout), lambda i, j: (i, j, 0)),
        out_shape=jax.ShapeDtypeStruct((n, m, cout), out_dtype),
        compiler_params=pltpu.CompilerParams(
            dimension_semantics=("parallel", "parallel"),
            vmem_limit_bytes=48 * 1024 * 1024,
        ),
    )(taps, w_packed, b_row)
    return out.reshape(n, oh, ow, cout)


# ---------------------------------------------------------------------------
# Parameters
# ---------------------------------------------------------------------------
def init_params(key):
    """Deterministic torch-layout Conv2d params (torch default uniform init)."""
    def conv_init(k, cout, cin, ksz=4):
        kw_, kb_ = jax.random.split(k)
        fan_in = cin * ksz * ksz
        bound = 1.0 / jnp.sqrt(jnp.float32(fan_in))
        w = jax.random.uniform(kw_, (cout, cin, ksz, ksz), jnp.float32, -bound, bound)
        b = jax.random.uniform(kb_, (cout,), jnp.float32, -bound, bound)
        return w, b

    k1, k2, k3, k4 = jax.random.split(key, 4)
    return {
        "conv1": conv_init(k1, 8, 3),
        "conv2": conv_init(k2, 16, 8),
        "conv3": conv_init(k3, 32, 16),
        "output": conv_init(k4, 1, 32),
    }


def prepare_params(params):
    """One-time re-layout: (Cout,Cin,4,4) -> K-packed (Kp, Cout) bf16; bias -> (1, Cout) f32.

    Row ordering is (kh*4 + kw)*Cin + c, matching _im2col_k_packed.
    """
    prepped = {}
    for name, (w, b) in params.items():
        cout, cin, kh, kw = w.shape
        wk = jnp.transpose(w, (2, 3, 1, 0)).reshape(kh * kw * cin, cout)
        k = wk.shape[0]
        kp = -(-k // 128) * 128
        if kp != k:
            wk = jnp.pad(wk, ((0, kp - k), (0, 0)))
        prepped[name] = (wk.astype(jnp.bfloat16),
                         b.reshape(1, cout).astype(jnp.float32))
    return prepped


# ---------------------------------------------------------------------------
# Forward pass (matches torch Discriminator.forward)
# ---------------------------------------------------------------------------
def discriminator_forward(kparams, x_nchw):
    """NCHW in -> NCHW out, like the torch module."""
    x = jnp.transpose(x_nchw, (0, 2, 3, 1)).astype(jnp.float32)          # NHWC, true C
    x = conv_block(x, *kparams["conv1"], mode="lrelu", out_dtype=jnp.bfloat16)
    x = conv_block(x, *kparams["conv2"], mode="in_lrelu", out_dtype=jnp.bfloat16)
    x = conv_block(x, *kparams["conv3"], mode="in_lrelu", out_dtype=jnp.bfloat16)
    x = conv_block(x, *kparams["output"], mode="none", out_dtype=jnp.float32)
    return jnp.transpose(x, (0, 3, 1, 2))


# ---------------------------------------------------------------------------
# Pure-JAX reference (for an in-script sanity check)
# ---------------------------------------------------------------------------
def _reference_forward(params, x_nchw):
    def conv(x, w, b):
        wh = jnp.transpose(w, (2, 3, 1, 0))                               # HWIO
        y = jax.lax.conv_general_dilated(
            x, wh, window_strides=(2, 2), padding=((1, 1), (1, 1)),
            dimension_numbers=("NHWC", "HWIO", "NHWC"))
        return y + b.reshape(1, 1, 1, -1)

    def inorm(x):
        mu = jnp.mean(x, axis=(1, 2), keepdims=True)
        var = jnp.mean((x - mu) ** 2, axis=(1, 2), keepdims=True)
        return (x - mu) * jax.lax.rsqrt(var + EPS)

    def lrelu(x):
        return jnp.where(x >= 0, x, LRELU_SLOPE * x)

    x = jnp.transpose(x_nchw, (0, 2, 3, 1)).astype(jnp.float32)
    x = lrelu(conv(x, *params["conv1"]))
    x = lrelu(inorm(conv(x, *params["conv2"])))
    x = lrelu(inorm(conv(x, *params["conv3"])))
    x = conv(x, *params["output"])
    return jnp.transpose(x, (0, 3, 1, 2))


if __name__ == "__main__":
    key = jax.random.PRNGKey(0)
    pkey, xkey = jax.random.split(key)
    params = init_params(pkey)
    kparams = prepare_params(params)

    # Small NCHW input consistent with the module (3 input channels, even spatial).
    x = jax.random.normal(xkey, (2, 3, 32, 32), jnp.float32)

    fwd = jax.jit(discriminator_forward)
    y = jax.block_until_ready(fwd(kparams, x))
    assert y.shape == (2, 1, 2, 2), y.shape

    # Loose-tolerance check vs a pure-JAX f32 reference (kernel uses bf16 MXU
    # inputs and bf16 inter-layer activations).
    y_ref = jax.block_until_ready(_reference_forward(params, x))
    err = float(jnp.max(jnp.abs(y - y_ref)))
    assert err < 1e-1, f"mismatch vs reference: max abs err = {err}"

    print("KERNEL_OK")
</pallas_src>

<mosaic_0001>
module attributes {stable_mosaic.version = 11 : i64} {
  func.func @_conv_block_kernel(%arg0: i32, %arg1: i32, %arg2: memref<1x256x128xbf16, #tpu.memory_space<vmem>>, %arg3: memref<128x8xbf16, #tpu.memory_space<vmem>>, %arg4: memref<1x8xf32, #tpu.memory_space<vmem>>, %arg5: memref<1x256x8xbf16, #tpu.memory_space<vmem>>) attributes {dimension_semantics = [#tpu.dimension_semantics<parallel>, #tpu.dimension_semantics<parallel>], iteration_bounds = array<i64: 2, 1>, scalar_prefetch = 0 : i64, scratch_operands = 0 : i64, tpu.core_type = #tpu.core_type<tc>, window_params = [{transform_indices = @transform_0, window_bounds = array<i64: 1, 256, 128>}, {pipeline_mode = #tpu.pipeline_mode<synchronous>, transform_indices = @transform_1, window_bounds = array<i64: 128, 8>}, {pipeline_mode = #tpu.pipeline_mode<synchronous>, transform_indices = @transform_2, window_bounds = array<i64: 1, 8>}, {transform_indices = @transform_3, window_bounds = array<i64: 1, 256, 8>}]} {
    %c0 = arith.constant 0 : index
    %c0_0 = arith.constant 0 : index
    %c0_1 = arith.constant 0 : index
    %0 = vector.load %arg2[%c0, %c0_0, %c0_1] : memref<1x256x128xbf16, #tpu.memory_space<vmem>>, vector<1x256x128xbf16>
    %1 = vector.shape_cast %0 : vector<1x256x128xbf16> to vector<256x128xbf16>
    %c0_2 = arith.constant 0 : index
    %c0_3 = arith.constant 0 : index
    %2 = vector.load %arg3[%c0_2, %c0_3] : memref<128x8xbf16, #tpu.memory_space<vmem>>, vector<128x8xbf16>
    %cst = arith.constant dense<0.000000e+00> : vector<256x8xf32>
    %3 = tpu.matmul %1, %2, %cst {dimension_numbers = #tpu.dot_dimension_numbers<[1], [0], [0], [1], [0, 0, 1, 1], [], []>} : vector<256x128xbf16>, vector<128x8xbf16>, vector<256x8xf32> -> vector<256x8xf32>
    %c0_4 = arith.constant 0 : index
    %c0_5 = arith.constant 0 : index
    %4 = vector.load %arg4[%c0_4, %c0_5] : memref<1x8xf32, #tpu.memory_space<vmem>>, vector<1x8xf32>
    %5 = vector.broadcast %4 : vector<1x8xf32> to vector<256x8xf32>
    %6 = arith.addf %3, %5 : vector<256x8xf32>
    %cst_6 = arith.constant 0.000000e+00 : f32
    %7 = vector.broadcast %cst_6 : f32 to vector<256x8xf32>
    %8 = arith.cmpf oge, %6, %7 : vector<256x8xf32>
    %cst_7 = arith.constant 2.000000e-01 : f32
    %9 = vector.broadcast %cst_7 : f32 to vector<256x8xf32>
    %10 = arith.mulf %9, %6 : vector<256x8xf32>
    %11 = arith.select %8, %6, %10 : vector<256x8xi1>, vector<256x8xf32>
    %12 = arith.truncf %11 : vector<256x8xf32> to vector<256x8xbf16>
    %c0_8 = arith.constant 0 : index
    %c0_9 = arith.constant 0 : index
    %c0_10 = arith.constant 0 : index
    %13 = vector.load %arg5[%c0_8, %c0_9, %c0_10] : memref<1x256x8xbf16, #tpu.memory_space<vmem>>, vector<1x256x8xbf16>
    %14 = vector.shape_cast %13 : vector<1x256x8xbf16> to vector<256x8xbf16>
    %15 = vector.shape_cast %12 : vector<256x8xbf16> to vector<1x256x8xbf16>
    tpu.vector_store %arg5[%c0_8, %c0_9, %c0_10], %15 {strides = array<i32>} : memref<1x256x8xbf16, #tpu.memory_space<vmem>>, vector<1x256x8xbf16>,
    return
  }
  func.func @transform_0(%arg0: i32, %arg1: i32) -> (i32, i32, i32) {
    %c0_i32 = arith.constant 0 : i32
    %c0_i32_0 = arith.constant 0 : i32
    return %arg0, %arg1, %c0_i32 : i32, i32, i32
  }
  func.func @transform_1(%arg0: i32, %arg1: i32) -> (i32, i32) {
    %c0_i32 = arith.constant 0 : i32
    %c0_i32_0 = arith.constant 0 : i32
    %c0_i32_1 = arith.constant 0 : i32
    return %c0_i32, %c0_i32_0 : i32, i32
  }
  func.func @transform_2(%arg0: i32, %arg1: i32) -> (i32, i32) {
    %c0_i32 = arith.constant 0 : i32
    %c0_i32_0 = arith.constant 0 : i32
    %c0_i32_1 = arith.constant 0 : i32
    return %c0_i32, %c0_i32_0 : i32, i32
  }
  func.func @transform_3(%arg0: i32, %arg1: i32) -> (i32, i32, i32) {
    %c0_i32 = arith.constant 0 : i32
    %c0_i32_0 = arith.constant 0 : i32
    return %arg0, %arg1, %c0_i32 : i32, i32, i32
  }
}

module attributes {stable_mosaic.version = 11 : i64} {
  func.func @_conv_block_kernel(%arg0: i32, %arg1: i32, %arg2: memref<1x64x128xbf16, #tpu.memory_space<vmem>>, %arg3: memref<128x16xbf16, #tpu.memory_space<vmem>>, %arg4: memref<1x16xf32, #tpu.memory_space<vmem>>, %arg5: memref<1x64x16xbf16, #tpu.memory_space<vmem>>) attributes {dimension_semantics = [#tpu.dimension_semantics<parallel>, #tpu.dimension_semantics<parallel>], iteration_bounds = array<i64: 2, 1>, scalar_prefetch = 0 : i64, scratch_operands = 0 : i64, tpu.core_type = #tpu.core_type<tc>, window_params = [{transform_indices = @transform_0, window_bounds = array<i64: 1, 64, 128>}, {pipeline_mode = #tpu.pipeline_mode<synchronous>, transform_indices = @transform_1, window_bounds = array<i64: 128, 16>}, {pipeline_mode = #tpu.pipeline_mode<synchronous>, transform_indices = @transform_2, window_bounds = array<i64: 1, 16>}, {transform_indices = @transform_3, window_bounds = array<i64: 1, 64, 16>}]} {
    %c0 = arith.constant 0 : index
    %c0_0 = arith.constant 0 : index
    %c0_1 = arith.constant 0 : index
    %0 = vector.load %arg2[%c0, %c0_0, %c0_1] : memref<1x64x128xbf16, #tpu.memory_space<vmem>>, vector<1x64x128xbf16>
    %1 = vector.shape_cast %0 : vector<1x64x128xbf16> to vector<64x128xbf16>
    %c0_2 = arith.constant 0 : index
    %c0_3 = arith.constant 0 : index
    %2 = vector.load %arg3[%c0_2, %c0_3] : memref<128x16xbf16, #tpu.memory_space<vmem>>, vector<128x16xbf16>
    %cst = arith.constant dense<0.000000e+00> : vector<64x16xf32>
    %3 = tpu.matmul %1, %2, %cst {dimension_numbers = #tpu.dot_dimension_numbers<[1], [0], [0], [1], [0, 0, 1, 1], [], []>} : vector<64x128xbf16>, vector<128x16xbf16>, vector<64x16xf32> -> vector<64x16xf32>
    %c0_4 = arith.constant 0 : index
    %c0_5 = arith.constant 0 : index
    %4 = vector.load %arg4[%c0_4, %c0_5] : memref<1x16xf32, #tpu.memory_space<vmem>>, vector<1x16xf32>
    %5 = vector.broadcast %4 : vector<1x16xf32> to vector<64x16xf32>
    %6 = arith.addf %3, %5 : vector<64x16xf32>
    %cst_6 = arith.constant dense<0.000000e+00> : vector<16xf32>
    %7 = vector.multi_reduction <add>, %6, %cst_6 [0] : vector<64x16xf32> to vector<16xf32>
    %8 = vector.shape_cast %7 : vector<16xf32> to vector<1x16xf32>
    %cst_7 = arith.constant 6.400000e+01 : f32
    %9 = vector.broadcast %cst_7 : f32 to vector<1x16xf32>
    %10 = arith.divf %8, %9 : vector<1x16xf32>
    %11 = vector.broadcast %10 : vector<1x16xf32> to vector<64x16xf32>
    %12 = arith.subf %6, %11 : vector<64x16xf32>
    %13 = arith.mulf %12, %12 : vector<64x16xf32>
    %cst_8 = arith.constant dense<0.000000e+00> : vector<16xf32>
    %14 = vector.multi_reduction <add>, %13, %cst_8 [0] : vector<64x16xf32> to vector<16xf32>
    %15 = vector.shape_cast %14 : vector<16xf32> to vector<1x16xf32>
    %cst_9 = arith.constant 6.400000e+01 : f32
    %16 = vector.broadcast %cst_9 : f32 to vector<1x16xf32>
    %17 = arith.divf %15, %16 : vector<1x16xf32>
    %cst_10 = arith.constant 9.99999974E-6 : f32
    %18 = vector.broadcast %cst_10 : f32 to vector<1x16xf32>
    %19 = arith.addf %17, %18 : vector<1x16xf32>
    %20 = math.rsqrt %19 : vector<1x16xf32>
    %21 = vector.broadcast %20 : vector<1x16xf32> to vector<64x16xf32>
    %22 = arith.mulf %12, %21 : vector<64x16xf32>
    %cst_11 = arith.constant 0.000000e+00 : f32
    %23 = vector.broadcast %cst_11 : f32 to vector<64x16xf32>
    %24 = arith.cmpf oge, %22, %23 : vector<64x16xf32>
    %cst_12 = arith.constant 2.000000e-01 : f32
    %25 = vector.broadcast %cst_12 : f32 to vector<64x16xf32>
    %26 = arith.mulf %25, %22 : vector<64x16xf32>
    %27 = arith.select %24, %22, %26 : vector<64x16xi1>, vector<64x16xf32>
    %28 = arith.truncf %27 : vector<64x16xf32> to vector<64x16xbf16>
    %c0_13 = arith.constant 0 : index
    %c0_14 = arith.constant 0 : index
    %c0_15 = arith.constant 0 : index
    %29 = vector.load %arg5[%c0_13, %c0_14, %c0_15] : memref<1x64x16xbf16, #tpu.memory_space<vmem>>, vector<1x64x16xbf16>
    %30 = vector.shape_cast %29 : vector<1x64x16xbf16> to vector<64x16xbf16>
    %31 = vector.shape_cast %28 : vector<64x16xbf16> to vector<1x64x16xbf16>
    tpu.vector_store %arg5[%c0_13, %c0_14, %c0_15], %31 {strides = array<i32>} : memref<1x64x16xbf16, #tpu.memory_space<vmem>>, vector<1x64x16xbf16>,
    return
  }
  func.func @transform_0(%arg0: i32, %arg1: i32) -> (i32, i32, i32) {
    %c0_i32 = arith.constant 0 : i32
    %c0_i32_0 = arith.constant 0 : i32
    return %arg0, %arg1, %c0_i32 : i32, i32, i32
  }
  func.func @transform_1(%arg0: i32, %arg1: i32) -> (i32, i32) {
    %c0_i32 = arith.constant 0 : i32
    %c0_i32_0 = arith.constant 0 : i32
    %c0_i32_1 = arith.constant 0 : i32
    return %c0_i32, %c0_i32_0 : i32, i32
  }
  func.func @transform_2(%arg0: i32, %arg1: i32) -> (i32, i32) {
    %c0_i32 = arith.constant 0 : i32
    %c0_i32_0 = arith.constant 0 : i32
    %c0_i32_1 = arith.constant 0 : i32
    return %c0_i32, %c0_i32_0 : i32, i32
  }
  func.func @transform_3(%arg0: i32, %arg1: i32) -> (i32, i32, i32) {
    %c0_i32 = arith.constant 0 : i32
    %c0_i32_0 = arith.constant 0 : i32
    return %arg0, %arg1, %c0_i32 : i32, i32, i32
  }
}

module attributes {stable_mosaic.version = 11 : i64} {
  func.func @_conv_block_kernel(%arg0: i32, %arg1: i32, %arg2: memref<1x16x256xbf16, #tpu.memory_space<vmem>>, %arg3: memref<256x32xbf16, #tpu.memory_space<vmem>>, %arg4: memref<1x32xf32, #tpu.memory_space<vmem>>, %arg5: memref<1x16x32xbf16, #tpu.memory_space<vmem>>) attributes {dimension_semantics = [#tpu.dimension_semantics<parallel>, #tpu.dimension_semantics<parallel>], iteration_bounds = array<i64: 2, 1>, scalar_prefetch = 0 : i64, scratch_operands = 0 : i64, tpu.core_type = #tpu.core_type<tc>, window_params = [{transform_indices = @transform_0, window_bounds = array<i64: 1, 16, 256>}, {pipeline_mode = #tpu.pipeline_mode<synchronous>, transform_indices = @transform_1, window_bounds = array<i64: 256, 32>}, {pipeline_mode = #tpu.pipeline_mode<synchronous>, transform_indices = @transform_2, window_bounds = array<i64: 1, 32>}, {transform_indices = @transform_3, window_bounds = array<i64: 1, 16, 32>}]} {
    %c0 = arith.constant 0 : index
    %c0_0 = arith.constant 0 : index
    %c0_1 = arith.constant 0 : index
    %0 = vector.load %arg2[%c0, %c0_0, %c0_1] : memref<1x16x256xbf16, #tpu.memory_space<vmem>>, vector<1x16x256xbf16>
    %1 = vector.shape_cast %0 : vector<1x16x256xbf16> to vector<16x256xbf16>
    %c0_2 = arith.constant 0 : index
    %c0_3 = arith.constant 0 : index
    %2 = vector.load %arg3[%c0_2, %c0_3] : memref<256x32xbf16, #tpu.memory_space<vmem>>, vector<256x32xbf16>
    %cst = arith.constant dense<0.000000e+00> : vector<16x32xf32>
    %3 = tpu.matmul %1, %2, %cst {dimension_numbers = #tpu.dot_dimension_numbers<[1], [0], [0], [1], [0, 0, 1, 1], [], []>} : vector<16x256xbf16>, vector<256x32xbf16>, vector<16x32xf32> -> vector<16x32xf32>
    %c0_4 = arith.constant 0 : index
    %c0_5 = arith.constant 0 : index
    %4 = vector.load %arg4[%c0_4, %c0_5] : memref<1x32xf32, #tpu.memory_space<vmem>>, vector<1x32xf32>
    %5 = vector.broadcast %4 : vector<1x32xf32> to vector<16x32xf32>
    %6 = arith.addf %3, %5 : vector<16x32xf32>
    %cst_6 = arith.constant dense<0.000000e+00> : vector<32xf32>
    %7 = vector.multi_reduction <add>, %6, %cst_6 [0] : vector<16x32xf32> to vector<32xf32>
    %8 = vector.shape_cast %7 : vector<32xf32> to vector<1x32xf32>
    %cst_7 = arith.constant 1.600000e+01 : f32
    %9 = vector.broadcast %cst_7 : f32 to vector<1x32xf32>
    %10 = arith.divf %8, %9 : vector<1x32xf32>
    %11 = vector.broadcast %10 : vector<1x32xf32> to vector<16x32xf32>
    %12 = arith.subf %6, %11 : vector<16x32xf32>
    %13 = arith.mulf %12, %12 : vector<16x32xf32>
    %cst_8 = arith.constant dense<0.000000e+00> : vector<32xf32>
    %14 = vector.multi_reduction <add>, %13, %cst_8 [0] : vector<16x32xf32> to vector<32xf32>
    %15 = vector.shape_cast %14 : vector<32xf32> to vector<1x32xf32>
    %cst_9 = arith.constant 1.600000e+01 : f32
    %16 = vector.broadcast %cst_9 : f32 to vector<1x32xf32>
    %17 = arith.divf %15, %16 : vector<1x32xf32>
    %cst_10 = arith.constant 9.99999974E-6 : f32
    %18 = vector.broadcast %cst_10 : f32 to vector<1x32xf32>
    %19 = arith.addf %17, %18 : vector<1x32xf32>
    %20 = math.rsqrt %19 : vector<1x32xf32>
    %21 = vector.broadcast %20 : vector<1x32xf32> to vector<16x32xf32>
    %22 = arith.mulf %12, %21 : vector<16x32xf32>
    %cst_11 = arith.constant 0.000000e+00 : f32
    %23 = vector.broadcast %cst_11 : f32 to vector<16x32xf32>
    %24 = arith.cmpf oge, %22, %23 : vector<16x32xf32>
    %cst_12 = arith.constant 2.000000e-01 : f32
    %25 = vector.broadcast %cst_12 : f32 to vector<16x32xf32>
    %26 = arith.mulf %25, %22 : vector<16x32xf32>
    %27 = arith.select %24, %22, %26 : vector<16x32xi1>, vector<16x32xf32>
    %28 = arith.truncf %27 : vector<16x32xf32> to vector<16x32xbf16>
    %c0_13 = arith.constant 0 : index
    %c0_14 = arith.constant 0 : index
    %c0_15 = arith.constant 0 : index
    %29 = vector.load %arg5[%c0_13, %c0_14, %c0_15] : memref<1x16x32xbf16, #tpu.memory_space<vmem>>, vector<1x16x32xbf16>
    %30 = vector.shape_cast %29 : vector<1x16x32xbf16> to vector<16x32xbf16>
    %31 = vector.shape_cast %28 : vector<16x32xbf16> to vector<1x16x32xbf16>
    tpu.vector_store %arg5[%c0_13, %c0_14, %c0_15], %31 {strides = array<i32>} : memref<1x16x32xbf16, #tpu.memory_space<vmem>>, vector<1x16x32xbf16>,
    return
  }
  func.func @transform_0(%arg0: i32, %arg1: i32) -> (i32, i32, i32) {
    %c0_i32 = arith.constant 0 : i32
    %c0_i32_0 = arith.constant 0 : i32
    return %arg0, %arg1, %c0_i32 : i32, i32, i32
  }
  func.func @transform_1(%arg0: i32, %arg1: i32) -> (i32, i32) {
    %c0_i32 = arith.constant 0 : i32
    %c0_i32_0 = arith.constant 0 : i32
    %c0_i32_1 = arith.constant 0 : i32
    return %c0_i32, %c0_i32_0 : i32, i32
  }
  func.func @transform_2(%arg0: i32, %arg1: i32) -> (i32, i32) {
    %c0_i32 = arith.constant 0 : i32
    %c0_i32_0 = arith.constant 0 : i32
    %c0_i32_1 = arith.constant 0 : i32
    return %c0_i32, %c0_i32_0 : i32, i32
  }
  func.func @transform_3(%arg0: i32, %arg1: i32) -> (i32, i32, i32) {
    %c0_i32 = arith.constant 0 : i32
    %c0_i32_0 = arith.constant 0 : i32
    return %arg0, %arg1, %c0_i32 : i32, i32, i32
  }
}

module attributes {stable_mosaic.version = 11 : i64} {
  func.func @_conv_block_kernel(%arg0: i32, %arg1: i32, %arg2: memref<1x4x512xbf16, #tpu.memory_space<vmem>>, %arg3: memref<512x1xbf16, #tpu.memory_space<vmem>>, %arg4: memref<1x1xf32, #tpu.memory_space<vmem>>, %arg5: memref<1x4x1xf32, #tpu.memory_space<vmem>>) attributes {dimension_semantics = [#tpu.dimension_semantics<parallel>, #tpu.dimension_semantics<parallel>], iteration_bounds = array<i64: 2, 1>, scalar_prefetch = 0 : i64, scratch_operands = 0 : i64, tpu.core_type = #tpu.core_type<tc>, window_params = [{transform_indices = @transform_0, window_bounds = array<i64: 1, 4, 512>}, {pipeline_mode = #tpu.pipeline_mode<synchronous>, transform_indices = @transform_1, window_bounds = array<i64: 512, 1>}, {pipeline_mode = #tpu.pipeline_mode<synchronous>, transform_indices = @transform_2, window_bounds = array<i64: 1, 1>}, {transform_indices = @transform_3, window_bounds = array<i64: 1, 4, 1>}]} {
    %c0 = arith.constant 0 : index
    %c0_0 = arith.constant 0 : index
    %c0_1 = arith.constant 0 : index
    %0 = vector.load %arg2[%c0, %c0_0, %c0_1] : memref<1x4x512xbf16, #tpu.memory_space<vmem>>, vector<1x4x512xbf16>
    %1 = vector.shape_cast %0 : vector<1x4x512xbf16> to vector<4x512xbf16>
    %c0_2 = arith.constant 0 : index
    %c0_3 = arith.constant 0 : index
    %2 = vector.load %arg3[%c0_2, %c0_3] : memref<512x1xbf16, #tpu.memory_space<vmem>>, vector<512x1xbf16>
    %cst = arith.constant dense<0.000000e+00> : vector<4x1xf32>
    %3 = tpu.matmul %1, %2, %cst {dimension_numbers = #tpu.dot_dimension_numbers<[1], [0], [0], [1], [0, 0, 1, 1], [], []>} : vector<4x512xbf16>, vector<512x1xbf16>, vector<4x1xf32> -> vector<4x1xf32>
    %c0_4 = arith.constant 0 : index
    %c0_5 = arith.constant 0 : index
    %4 = vector.load %arg4[%c0_4, %c0_5] : memref<1x1xf32, #tpu.memory_space<vmem>>, vector<1x1xf32>
    %5 = vector.broadcast %4 : vector<1x1xf32> to vector<4x1xf32>
    %6 = arith.addf %3, %5 : vector<4x1xf32>
    %c0_6 = arith.constant 0 : index
    %c0_7 = arith.constant 0 : index
    %c0_8 = arith.constant 0 : index
    %7 = vector.load %arg5[%c0_6, %c0_7, %c0_8] : memref<1x4x1xf32, #tpu.memory_space<vmem>>, vector<1x4x1xf32>
    %8 = vector.shape_cast %7 : vector<1x4x1xf32> to vector<4x1xf32>
    %9 = vector.shape_cast %6 : vector<4x1xf32> to vector<1x4x1xf32>
    tpu.vector_store %arg5[%c0_6, %c0_7, %c0_8], %9 {strides = array<i32>} : memref<1x4x1xf32, #tpu.memory_space<vmem>>, vector<1x4x1xf32>,
    return
  }
  func.func @transform_0(%arg0: i32, %arg1: i32) -> (i32, i32, i32) {
    %c0_i32 = arith.constant 0 : i32
    %c0_i32_0 = arith.constant 0 : i32
    return %arg0, %arg1, %c0_i32 : i32, i32, i32
  }
  func.func @transform_1(%arg0: i32, %arg1: i32) -> (i32, i32) {
    %c0_i32 = arith.constant 0 : i32
    %c0_i32_0 = arith.constant 0 : i32
    %c0_i32_1 = arith.constant 0 : i32
    return %c0_i32, %c0_i32_0 : i32, i32
  }
  func.func @transform_2(%arg0: i32, %arg1: i32) -> (i32, i32) {
    %c0_i32 = arith.constant 0 : i32
    %c0_i32_0 = arith.constant 0 : i32
    %c0_i32_1 = arith.constant 0 : i32
    return %c0_i32, %c0_i32_0 : i32, i32
  }
  func.func @transform_3(%arg0: i32, %arg1: i32) -> (i32, i32, i32) {
    %c0_i32 = arith.constant 0 : i32
    %c0_i32_0 = arith.constant 0 : i32
    return %arg0, %arg1, %c0_i32 : i32, i32, i32
  }
}

</mosaic_0001>

<bundles_post_ra>
// kernel: discriminator_forward.4
= control target key start
LH: loop header
LB: loop body
LE: loop exit
PB: predicated region body
PF: predicated region fallthrough
CT: control target
= control target key end

     0   :  { %s1197_s12 = smov 0   ;;  %s1199_s13 = smov 0   ;;  %s1383_s0 = inlined_call_operand.vmem [shape: bf16[2,256,128], index: 0, kind: input, shape index: {}]   ;;  %s1384_s1 = inlined_call_operand.vmem [shape: bf16[128,8], index: 1, kind: input, shape index: {}]   ;;  %s1385_s2 = inlined_call_operand.vmem [shape: f32[1,8], index: 2, kind: input, shape index: {}]   ;;  %s1386_s3 = inlined_call_operand.vmem [shape: bf16[2,256,8], index: 3, kind: output, shape index: {}]  }
   0x1   :  { %s1201_s14 = smov 0  }
   0x2 LB: > { %s25_s15 = sadd.s32 1, %s1171_s13  ;;  %p919_p0 = scmp.ge.s32.totalorder %s1175_s14, 1  ;;  %s1175_s14 = sphi %s1201_s14, %s13_s14   ;;  %s1171_s13 = sphi %s1199_s13, %s1388_s13   ;;  %s1167_s12 = sphi %s1197_s12, %s1387_s12  }
   0x3   : > { %p27_p1 = scmp.ge.s32.totalorder %s25_s15, 2  ;;  %p158_p2 = scmp.lt.s32.totalorder %s1175_s14, 3 }
   0x5   : > { %s1390_s15 = smov (%p27_p1, %s25_s15), 0  ;;  %p159_p3 = pnand %p919_p0, %p158_p2 }
   0x6   : > { %v1129_v0 = vld [vmem:[%s1384_s1] sm:$0xff] (!%p159_p3)   ;;  %p191_p4 = scmp.lt.s32.totalorder (!%p159_p3), %s1167_s12, 1  ;;  %v1130_v1 = vld [vmem:[%s1384_s1 + $0x8] sm:$0xff] (!%p159_p3)   ;;  %v1131_v2 = vld [vmem:[%s1384_s1 + $0x10] sm:$0xff] (!%p159_p3)   ;;  %vm795_vm0 = vcmask (!%p159_p3), 60416  }
   0x7   : > { %162 = sbr.rel (%p159_p3) target bundleno = 297 (0x129), region = 32  ;;  %1041 = vmatprep.subr.bf16.mxu0 (!%p159_p3), %v1129_v0  ;;  %1089 = vmatprep.subr.bf16.mxu1 (!%p159_p3), %v1129_v0  ;;  %v1132_v3 = vld [vmem:[%s1384_s1 + $0x18] sm:$0xff] (!%p159_p3)   ;;  %v1133_v6 = vld [vmem:[%s1384_s1 + $0x20] sm:$0xff] (!%p159_p3)   ;;  %v1134_v7 = vld [vmem:[%s1384_s1 + $0x28] sm:$0xff] (!%p159_p3)  }
   0x8   : > { %1042 = vmatpush3.bf16.msra.mxu0 (!%p159_p3), %v1129_v0  ;;  %1097 = vmatpush3.bf16.msra.mxu1 (!%p159_p3), %v1129_v0  ;;  %v1135_v8 = vld [vmem:[%s1384_s1 + $0x30] sm:$0xff] (!%p159_p3)   ;;  %v1136_v9 = vld [vmem:[%s1384_s1 + $0x38] sm:$0xff] (!%p159_p3)   ;;  %v1268_v24 = vld [vmem:[%s1385_s2] ss:$0 sm:$0xff] (!%p159_p3) }
   0x9   : > { %1043 = vmatprep.subr.bf16.mxu0 (!%p159_p3), %v1130_v1  ;;  %1090 = vmatprep.subr.bf16.mxu1 (!%p159_p3), %v1130_v1 }
   0xc   : > { %1044 = vmatpush3.bf16.msra.mxu0 (!%p159_p3), %v1130_v1  ;;  %1098 = vmatpush3.bf16.msra.mxu1 (!%p159_p3), %v1130_v1 }
   0xd   : > { %1045 = vmatprep.subr.bf16.mxu0 (!%p159_p3), %v1131_v2  ;;  %1091 = vmatprep.subr.bf16.mxu1 (!%p159_p3), %v1131_v2 }
   0xe   : > { %s1392_s12 = smov (!%p191_p4, %s1167_s12), 1 }
   0xf   : > { %s983_s22 = sshll.u32 %s1392_s12, 7 }
  0x10   : > { %s1232_s25 = scalar_lea.vmem %s1383_s0, %s983_s22  ;;  %1046 = vmatpush3.bf16.msra.mxu0 %v1131_v2  ;;  %1099 = vmatpush3.bf16.msra.mxu1 %v1131_v2  ;;  %s1279_s17 = scalar_lea.vmem %s1386_s3, %s983_s22 }
  0x11   : > { %v1137_v4 = vld [vmem:[%s1232_s25] sm:$0xff]   ;;  %1047 = vmatprep.subr.bf16.mxu0 %v1132_v3  ;;  %1092 = vmatprep.subr.bf16.mxu1 %v1132_v3  ;;  %v1139_v10 = vld [vmem:[%s1232_s25 + $0x8] sm:$0xff]   ;;  %v1141_v12 = vld [vmem:[%s1232_s25 + $0x10] sm:$0xff]  }
  0x12   : > { %v1138_v5 = vld [vmem:[%s1232_s25 + $0x40] sm:$0xff]   ;;  %1057 = vmatprep.mubr.bf16.mxu0 %v1137_v4  ;;  %v1140_v11 = vld [vmem:[%s1232_s25 + $0x48] sm:$0xff]   ;;  %v1142_v13 = vld [vmem:[%s1232_s25 + $0x50] sm:$0xff]  }
  0x13   : > { %1073 = vmatprep.mubr.bf16.mxu1 %v1138_v5  ;;  %v1143_v14 = vld [vmem:[%s1232_s25 + $0x18] sm:$0xff]   ;;  %v1145_v16 = vld [vmem:[%s1232_s25 + $0x20] sm:$0xff]   ;;  %v1147_v18 = vld [vmem:[%s1232_s25 + $0x28] sm:$0xff]  }
  0x14   : > { %1048 = vmatpush3.bf16.msra.mxu0 %v1132_v3  ;;  %1100 = vmatpush3.bf16.msra.mxu1 %v1132_v3  ;;  %v1144_v15 = vld [vmem:[%s1232_s25 + $0x58] sm:$0xff]   ;;  %v1146_v17 = vld [vmem:[%s1232_s25 + $0x60] sm:$0xff]   ;;  %v1148_v19 = vld [vmem:[%s1232_s25 + $0x68] sm:$0xff]  }
  0x15   : > { %1049 = vmatprep.subr.bf16.mxu0 %v1133_v6  ;;  %1093 = vmatprep.subr.bf16.mxu1 %v1133_v6  ;;  %v1149_v20 = vld [vmem:[%s1232_s25 + $0x30] sm:$0xff]   ;;  %v1151_v22 = vld [vmem:[%s1232_s25 + $0x38] sm:$0xff]  }
  0x16   : > { %v1150_v21 = vld [vmem:[%s1232_s25 + $0x70] sm:$0xff]   ;;  %v1152_v23 = vld [vmem:[%s1232_s25 + $0x78] sm:$0xff]  }
  0x18   : > { %1050 = vmatpush3.bf16.msra.mxu0 %v1133_v6  ;;  %1101 = vmatpush3.bf16.msra.mxu1 %v1133_v6 }
  0x19   : > { %1051 = vmatprep.subr.bf16.mxu0 %v1134_v7  ;;  %1094 = vmatprep.subr.bf16.mxu1 %v1134_v7 }
  0x1c   : > { %1052 = vmatpush3.bf16.msra.mxu0 %v1134_v7  ;;  %1102 = vmatpush3.bf16.msra.mxu1 %v1134_v7 }
  0x1d   : > { %1053 = vmatprep.subr.bf16.mxu0 %v1135_v8  ;;  %1095 = vmatprep.subr.bf16.mxu1 %v1135_v8 }
  0x20   : > { %1054 = vmatpush3.bf16.msra.mxu0 %v1135_v8  ;;  %1103 = vmatpush3.bf16.msra.mxu1 %v1135_v8 }
  0x21   : > { %1055 = vmatprep.subr.bf16.mxu0 %v1136_v9  ;;  %1096 = vmatprep.subr.bf16.mxu1 %v1136_v9 }
  0x24   : > { %1056 = vmatpush3.bf16.msra.mxu0 %v1136_v9  ;;  %1104 = vmatpush3.bf16.msra.mxu1 %v1136_v9 }
  0x27   : > { %1058 = vmatmul.mubr.bf16.vlgmr.msra.gmra.mrb[0].mxu0 %v1139_v10  ;;  %1074 = vmatmul.mubr.bf16.vlgmr.msra.gmra.mrb[0].mxu1 %v1140_v11 }
  0x28   : > { %1061 = vmatprep.mubr.bf16.mxu0 %v1141_v12  ;;  %1077 = vmatprep.mubr.bf16.mxu1 %v1142_v13 }
  0x2f   : > { %1062 = vmatmul.mubr.bf16.gmra.mrb[4].mxu0 %v1143_v14  ;;  %1078 = vmatmul.mubr.bf16.gmra.mrb[4].mxu1 %v1144_v15 }
  0x30   : > { %1065 = vmatprep.mubr.bf16.mxu0 %v1145_v16  ;;  %1081 = vmatprep.mubr.bf16.mxu1 %v1146_v17 }
  0x37   : > { %1066 = vmatmul.mubr.bf16.gmra.mrb[8].mxu0 %v1147_v18  ;;  %1082 = vmatmul.mubr.bf16.gmra.mrb[8].mxu1 %v1148_v19 }
  0x38   : > { %1069 = vmatprep.mubr.bf16.mxu0 %v1149_v20  ;;  %1085 = vmatprep.mubr.bf16.mxu1 %v1150_v21 }
  0x3f   : > { %1070 = vmatmul.mubr.bf16.gmra.mrb[12].mxu0 %v1151_v22  ;;  %1086 = vmatmul.mubr.bf16.gmra.mrb[12].mxu1 %v1152_v23 }
  0xfa   : > { %v1059_v25 = vpop.f32.mrb[0].mxu0  ;;  %v1075_v26 = vpop.f32.mrb[0].mxu1 }
  0xfb   : > { %v453_v27 = vadd.f32 %v1059_v25, %v1268_v24  ;;  %v517_v28 = vadd.f32 %v1075_v26, %v1268_v24  ;;  %v444_v29 = vpop.f32.mrb[1].mxu0  ;;  %v508_v30 = vpop.f32.mrb[1].mxu1 }
  0xfc   : > { %v445_v31 = vadd.f32 %v1268_v24, %v444_v29  ;;  %v509_v32 = vadd.f32 %v1268_v24, %v508_v30  ;;  %v1060_v33 = vpop.f32.mrb[2].mxu0  ;;  %v1076_v34 = vpop.f32.mrb[2].mxu1 }
  0xfd   : > { %vm573_vm1 = vcmp.ge.f32.partialorder %v453_v27, 0.0  ;;  %v605_v35 = vmul.f32 0.2, %v453_v27  ;;  %vm589_vm2 = vcmp.ge.f32.partialorder %v517_v28, 0.0  ;;  %v621_v36 = vmul.f32 0.2, %v517_v28 }
  0xfe   : > { %vm571_vm3 = vcmp.ge.f32.partialorder %v445_v31, 0.0  ;;  %v603_v37 = vmul.f32 0.2, %v445_v31  ;;  %vm587_vm4 = vcmp.ge.f32.partialorder %v509_v32, 0.0  ;;  %v619_v38 = vmul.f32 0.2, %v509_v32 }
  0xff   : > { %v637_v39 = vsel %vm573_vm1, %v453_v27, %v605_v35  ;;  %v653_v40 = vsel %vm589_vm2, %v517_v28, %v621_v36  ;;  %v456_v41 = vadd.f32 %v1060_v33, %v1268_v24  ;;  %v520_v42 = vadd.f32 %v1076_v34, %v1268_v24  ;;  %v447_v43 = vpop.f32.mrb[3].mxu0  ;;  %v511_v44 = vpop.f32.mrb[3].mxu1 }
 0x100   : > { %v987_v45 = vpack.c.bf16 %v637_v39, %v637_v39  ;;  %v1003_v46 = vpack.c.bf16 %v653_v40, %v653_v40  ;;  %v635_v47 = vsel %vm571_vm3, %v445_v31, %v603_v37  ;;  %v651_v48 = vsel %vm587_vm4, %v509_v32, %v619_v38 }
 0x101   : > { %v985_v49 = vpack.c.bf16 %v635_v47, %v635_v47  ;;  %v1001_v50 = vpack.c.bf16 %v651_v48, %v651_v48  ;;  %vm574_vm5 = vcmp.ge.f32.partialorder %v456_v41, 0.0  ;;  %v606_v51 = vmul.f32 0.2, %v456_v41 }
 0x102   : > { %798 = vst.msk [vmem:[%s1279_s17 + $0x8] sm:$0xf] %vm795_vm0, %v987_v45  ;;  %814 = vst.msk [vmem:[%s1279_s17 + $0x48] sm:$0xf] %vm795_vm0, %v1003_v46  ;;  %vm590_vm6 = vcmp.ge.f32.partialorder %v520_v42, 0.0  ;;  %v448_v53 = vadd.f32 %v1268_v24, %v447_v43  ;;  %v512_v54 = vadd.f32 %v1268_v24, %v511_v44  ;;  %v1063_v55 = vpop.f32.mrb[4].mxu0 }
 0x103   : > { %v622_v52 = vmul.f32 0.2, %v520_v42  ;;  %v1079_v56 = vpop.f32.mrb[4].mxu1  ;;  %796 = vst.msk [vmem:[%s1279_s17] sm:$0xf] %vm795_vm0, %v985_v49  ;;  %v638_v57 = vsel %vm574_vm5, %v456_v41, %v606_v51  ;;  %v469_v58 = vadd.f32 %v1063_v55, %v1268_v24  ;;  %v460_v60 = vpop.f32.mrb[5].mxu0 }
 0x104   : > { %812 = vst.msk [vmem:[%s1279_s17 + $0x40] sm:$0xf] %vm795_vm0, %v1001_v50  ;;  %v533_v59 = vadd.f32 %v1079_v56, %v1268_v24  ;;  %v524_v61 = vpop.f32.mrb[5].mxu1  ;;  %v988_v62 = vpack.c.bf16 %v638_v57, %v638_v57  ;;  %vm572_vm7 = vcmp.ge.f32.partialorder %v448_v53, 0.0  ;;  %v604_v0 = vmul.f32 0.2, %v448_v53 }
 0x105   : > { %v654_v63 = vsel %vm590_vm6, %v520_v42, %v622_v52  ;;  %v1064_v1 = vpop.f32.mrb[6].mxu0  ;;  %v1080_v2 = vpop.f32.mrb[6].mxu1  ;;  %vm588_vm8 = vcmp.ge.f32.partialorder %v512_v54, 0.0  ;;  %v620_v4 = vmul.f32 0.2, %v512_v54  ;;  %vm577_vm9 = vcmp.ge.f32.partialorder %v469_v58, 0.0 }
 0x106   : > { %v1004_v3 = vpack.c.bf16 %v654_v63, %v654_v63  ;;  %v463_v5 = vpop.f32.mrb[7].mxu0  ;;  %v527_v6 = vpop.f32.mrb[7].mxu1  ;;  %799 = vst.msk [vmem:[%s1279_s17 + $0xc] sm:$0xf] %vm795_vm0, %v988_v62  ;;  %v636_v7 = vsel %vm572_vm7, %v448_v53, %v604_v0  ;;  %v609_v8 = vmul.f32 0.2, %v469_v58  ;;  %v461_v12 = vadd.f32 %v1268_v24, %v460_v60 }
 0x107   : > { %vm593_vm10 = vcmp.ge.f32.partialorder %v533_v59, 0.0  ;;  %v625_v9 = vmul.f32 0.2, %v533_v59  ;;  %v986_v10 = vpack.c.bf16 %v636_v7, %v636_v7  ;;  %v652_v11 = vsel %vm588_vm8, %v512_v54, %v620_v4 }
 0x108   : > { %815 = vst.msk [vmem:[%s1279_s17 + $0x4c] sm:$0xf] %vm795_vm0, %v1004_v3  ;;  %v525_v13 = vadd.f32 %v1268_v24, %v524_v61  ;;  %v1002_v14 = vpack.c.bf16 %v652_v11, %v652_v11  ;;  %v641_v15 = vsel %vm577_vm9, %v469_v58, %v609_v8  ;;  %v472_v17 = vadd.f32 %v1064_v1, %v1268_v24 }
 0x109   : > { %v657_v16 = vsel %vm593_vm10, %v533_v59, %v625_v9  ;;  %797 = vst.msk [vmem:[%s1279_s17 + $0x4] sm:$0xf] %vm795_vm0, %v986_v10  ;;  %v991_v18 = vpack.c.bf16 %v641_v15, %v641_v15  ;;  %vm575_vm11 = vcmp.ge.f32.partialorder %v461_v12, 0.0  ;;  %v607_v20 = vmul.f32 0.2, %v461_v12 }
 0x10a   : > { %v1007_v19 = vpack.c.bf16 %v657_v16, %v657_v16  ;;  %813 = vst.msk [vmem:[%s1279_s17 + $0x44] sm:$0xf] %vm795_vm0, %v1002_v14  ;;  %vm591_vm12 = vcmp.ge.f32.partialorder %v525_v13, 0.0  ;;  %v623_v21 = vmul.f32 0.2, %v525_v13  ;;  %vm578_vm13 = vcmp.ge.f32.partialorder %v472_v17, 0.0 }
 0x10b   : > { %v610_v22 = vmul.f32 0.2, %v472_v17  ;;  %802 = vst.msk [vmem:[%s1279_s17 + $0x18] sm:$0xf] %vm795_vm0, %v991_v18  ;;  %v639_v23 = vsel %vm575_vm11, %v461_v12, %v607_v20  ;;  %v536_v25 = vadd.f32 %v1080_v2, %v1268_v24  ;;  %v464_v26 = vadd.f32 %v1268_v24, %v463_v5  ;;  %v1067_v28 = vpop.f32.mrb[8].mxu0  ;;  %v1083_v29 = vpop.f32.mrb[8].mxu1 }
 0x10c   : > { %818 = vst.msk [vmem:[%s1279_s17 + $0x58] sm:$0xf] %vm795_vm0, %v1007_v19  ;;  %v528_v27 = vadd.f32 %v1268_v24, %v527_v6  ;;  %v989_v30 = vpack.c.bf16 %v639_v23, %v639_v23  ;;  %v655_v31 = vsel %vm591_vm12, %v525_v13, %v623_v21  ;;  %v485_v33 = vadd.f32 %v1067_v28, %v1268_v24  ;;  %v476_v34 = vpop.f32.mrb[9].mxu0  ;;  %v540_v35 = vpop.f32.mrb[9].mxu1 }
 0x10d   : > { %v642_v32 = vsel %vm578_vm13, %v472_v17, %v610_v22  ;;  %v1005_v36 = vpack.c.bf16 %v655_v31, %v655_v31  ;;  %vm594_vm14 = vcmp.ge.f32.partialorder %v536_v25, 0.0  ;;  %v626_v38 = vmul.f32 0.2, %v536_v25  ;;  %v1068_v39 = vpop.f32.mrb[10].mxu0  ;;  %v1084_v40 = vpop.f32.mrb[10].mxu1 }
 0x10e   : > { %v992_v37 = vpack.c.bf16 %v642_v32, %v642_v32  ;;  %800 = vst.msk [vmem:[%s1279_s17 + $0x10] sm:$0xf] %vm795_vm0, %v989_v30  ;;  %vm576_vm15 = vcmp.ge.f32.partialorder %v464_v26, 0.0  ;;  %v608_v41 = vmul.f32 0.2, %v464_v26  ;;  %vm592_vm1 = vcmp.ge.f32.partialorder %v528_v27, 0.0 }
 0x10f   : > { %v624_v42 = vmul.f32 0.2, %v528_v27  ;;  %816 = vst.msk [vmem:[%s1279_s17 + $0x50] sm:$0xf] %vm795_vm0, %v1005_v36  ;;  %v658_v43 = vsel %vm594_vm14, %v536_v25, %v626_v38  ;;  %vm581_vm2 = vcmp.ge.f32.partialorder %v485_v33, 0.0  ;;  %v549_v45 = vadd.f32 %v1083_v29, %v1268_v24  ;;  %v479_v46 = vpop.f32.mrb[11].mxu0 }
 0x110   : > { %803 = vst.msk [vmem:[%s1279_s17 + $0x1c] sm:$0xf] %vm795_vm0, %v992_v37  ;;  %v613_v44 = vmul.f32 0.2, %v485_v33  ;;  %v543_v47 = vpop.f32.mrb[11].mxu1  ;;  %v1008_v48 = vpack.c.bf16 %v658_v43, %v658_v43  ;;  %v640_v49 = vsel %vm576_vm15, %v464_v26, %v608_v41  ;;  %v477_v51 = vadd.f32 %v1268_v24, %v476_v34 }
 0x111   : > { %v656_v50 = vsel %vm592_vm1, %v528_v27, %v624_v42  ;;  %v990_v52 = vpack.c.bf16 %v640_v49, %v640_v49  ;;  %vm597_vm3 = vcmp.ge.f32.partialorder %v549_v45, 0.0  ;;  %v629_v56 = vmul.f32 0.2, %v549_v45 }
 0x112   : > { %v1006_v53 = vpack.c.bf16 %v656_v50, %v656_v50  ;;  %v645_v54 = vsel %vm581_vm2, %v485_v33, %v613_v44  ;;  %819 = vst.msk [vmem:[%s1279_s17 + $0x5c] sm:$0xf] %vm795_vm0, %v1008_v48  ;;  %vm579_vm4 = vcmp.ge.f32.partialorder %v477_v51, 0.0  ;;  %v611_v57 = vmul.f32 0.2, %v477_v51  ;;  %v1071_v58 = vpop.f32.mrb[12].mxu0 }
 0x113   : > { %v995_v55 = vpack.c.bf16 %v645_v54, %v645_v54  ;;  %801 = vst.msk [vmem:[%s1279_s17 + $0x14] sm:$0xf] %vm795_vm0, %v990_v52  ;;  %v541_v59 = vadd.f32 %v1268_v24, %v540_v35  ;;  %v488_v60 = vadd.f32 %v1068_v39, %v1268_v24  ;;  %v552_v61 = vadd.f32 %v1084_v40, %v1268_v24  ;;  %v1087_v63 = vpop.f32.mrb[12].mxu1  ;;  %v492_v0 = vpop.f32.mrb[13].mxu0 }
 0x114   : > { %817 = vst.msk [vmem:[%s1279_s17 + $0x54] sm:$0xf] %vm795_vm0, %v1006_v53  ;;  %v480_v62 = vadd.f32 %v1268_v24, %v479_v46  ;;  %v661_v1 = vsel %vm597_vm3, %v549_v45, %v629_v56  ;;  %v643_v2 = vsel %vm579_vm4, %v477_v51, %v611_v57  ;;  %v544_v3 = vadd.f32 %v1268_v24, %v543_v47  ;;  %v556_v5 = vpop.f32.mrb[13].mxu1  ;;  %v1072_v6 = vpop.f32.mrb[14].mxu0 }
 0x115   : > { %806 = vst.msk [vmem:[%s1279_s17 + $0x28] sm:$0xf] %vm795_vm0, %v995_v55  ;;  %v501_v4 = vadd.f32 %v1071_v58, %v1268_v24  ;;  %v1011_v7 = vpack.c.bf16 %v661_v1, %v661_v1  ;;  %v993_v8 = vpack.c.bf16 %v643_v2, %v643_v2  ;;  %vm595_vm5 = vcmp.ge.f32.partialorder %v541_v59, 0.0  ;;  %v1088_v10 = vpop.f32.mrb[14].mxu1  ;;  %v495_v11 = vpop.f32.mrb[15].mxu0 }
 0x116   : > { %v627_v9 = vmul.f32 0.2, %v541_v59  ;;  %vm582_vm6 = vcmp.ge.f32.partialorder %v488_v60, 0.0  ;;  %v614_v12 = vmul.f32 0.2, %v488_v60  ;;  %vm598_vm7 = vcmp.ge.f32.partialorder %v552_v61, 0.0 }
 0x117   : > { %v630_v13 = vmul.f32 0.2, %v552_v61  ;;  %822 = vst.msk [vmem:[%s1279_s17 + $0x68] sm:$0xf] %vm795_vm0, %v1011_v7  ;;  %804 = vst.msk [vmem:[%s1279_s17 + $0x20] sm:$0xf] %vm795_vm0, %v993_v8  ;;  %v565_v28 = vadd.f32 %v1087_v63, %v1268_v24  ;;  %v493_v30 = vadd.f32 %v1268_v24, %v492_v0  ;;  %v557_v31 = vadd.f32 %v1268_v24, %v556_v5 }
 0x118   : > { %v659_v14 = vsel %vm595_vm5, %v541_v59, %v627_v9  ;;  %vm580_vm8 = vcmp.ge.f32.partialorder %v480_v62, 0.0  ;;  %v612_v15 = vmul.f32 0.2, %v480_v62  ;;  %vm596_vm9 = vcmp.ge.f32.partialorder %v544_v3, 0.0  ;;  %v559_v16 = vpop.f32.mrb[15].mxu1 }
 0x119   : > { %v1009_v17 = vpack.c.bf16 %v659_v14, %v659_v14  ;;  %v646_v18 = vsel %vm582_vm6, %v488_v60, %v614_v12  ;;  %v662_v19 = vsel %vm598_vm7, %v552_v61, %v630_v13  ;;  %v628_v20 = vmul.f32 0.2, %v544_v3 }
 0x11a   : > { %v996_v21 = vpack.c.bf16 %v646_v18, %v646_v18  ;;  %v1012_v22 = vpack.c.bf16 %v662_v19, %v662_v19  ;;  %v644_v23 = vsel %vm580_vm8, %v480_v62, %v612_v15  ;;  %vm585_vm10 = vcmp.ge.f32.partialorder %v501_v4, 0.0 }
 0x11b   : > { %820 = vst.msk [vmem:[%s1279_s17 + $0x60] sm:$0xf] %vm795_vm0, %v1009_v17  ;;  %v994_v25 = vpack.c.bf16 %v644_v23, %v644_v23  ;;  %v660_v26 = vsel %vm596_vm9, %v544_v3, %v628_v20  ;;  %v617_v27 = vmul.f32 0.2, %v501_v4  ;;  %v504_v32 = vadd.f32 %v1072_v6, %v1268_v24 }
 0x11c   : > { %807 = vst.msk [vmem:[%s1279_s17 + $0x2c] sm:$0xf] %vm795_vm0, %v996_v21  ;;  %823 = vst.msk [vmem:[%s1279_s17 + $0x6c] sm:$0xf] %vm795_vm0, %v1012_v22  ;;  %v1010_v29 = vpack.c.bf16 %v660_v26, %v660_v26  ;;  %vm601_vm11 = vcmp.ge.f32.partialorder %v565_v28, 0.0  ;;  %v568_v35 = vadd.f32 %v1088_v10, %v1268_v24  ;;  %vm583_vm12 = vcmp.ge.f32.partialorder %v493_v30, 0.0 }
 0x11d   : > { %805 = vst.msk [vmem:[%s1279_s17 + $0x24] sm:$0xf] %vm795_vm0, %v994_v25  ;;  %v649_v33 = vsel %vm585_vm10, %v501_v4, %v617_v27  ;;  %v633_v34 = vmul.f32 0.2, %v565_v28  ;;  %v615_v37 = vmul.f32 0.2, %v493_v30  ;;  %v496_v47 = vadd.f32 %v1268_v24, %v495_v11 }
 0x11e   : > { %821 = vst.msk [vmem:[%s1279_s17 + $0x64] sm:$0xf] %vm795_vm0, %v1010_v29  ;;  %v999_v36 = vpack.c.bf16 %v649_v33, %v649_v33  ;;  %vm599_vm13 = vcmp.ge.f32.partialorder %v557_v31, 0.0  ;;  %v631_v39 = vmul.f32 0.2, %v557_v31  ;;  %vm586_vm14 = vcmp.ge.f32.partialorder %v504_v32, 0.0 }
 0x11f   : > { %v665_v38 = vsel %vm601_vm11, %v565_v28, %v633_v34  ;;  %v618_v40 = vmul.f32 0.2, %v504_v32  ;;  %v647_v42 = vsel %vm583_vm12, %v493_v30, %v615_v37  ;;  %vm602_vm15 = vcmp.ge.f32.partialorder %v568_v35, 0.0 }
 0x120   : > { %810 = vst.msk [vmem:[%s1279_s17 + $0x38] sm:$0xf] %vm795_vm0, %v999_v36  ;;  %v1015_v41 = vpack.c.bf16 %v665_v38, %v665_v38  ;;  %v634_v43 = vmul.f32 0.2, %v568_v35  ;;  %v997_v44 = vpack.c.bf16 %v647_v42, %v647_v42  ;;  %v663_v45 = vsel %vm599_vm13, %v557_v31, %v631_v39 }
 0x121   : > { %v650_v46 = vsel %vm586_vm14, %v504_v32, %v618_v40  ;;  %v1013_v48 = vpack.c.bf16 %v663_v45, %v663_v45  ;;  %v560_v51 = vadd.f32 %v1268_v24, %v559_v16  ;;  %vm584_vm1 = vcmp.ge.f32.partialorder %v496_v47, 0.0 }
 0x122   : > { %826 = vst.msk [vmem:[%s1279_s17 + $0x78] sm:$0xf] %vm795_vm0, %v1015_v41  ;;  %v1000_v49 = vpack.c.bf16 %v650_v46, %v650_v46  ;;  %v666_v50 = vsel %vm602_vm15, %v568_v35, %v634_v43  ;;  %808 = vst.msk [vmem:[%s1279_s17 + $0x30] sm:$0xf] %vm795_vm0, %v997_v44  ;;  %v616_v53 = vmul.f32 0.2, %v496_v47 }
 0x123   : > { %v1016_v52 = vpack.c.bf16 %v666_v50, %v666_v50  ;;  %824 = vst.msk [vmem:[%s1279_s17 + $0x70] sm:$0xf] %vm795_vm0, %v1013_v48  ;;  %vm600_vm2 = vcmp.ge.f32.partialorder %v560_v51, 0.0  ;;  %v632_v54 = vmul.f32 0.2, %v560_v51 }
 0x124   : > { %811 = vst.msk [vmem:[%s1279_s17 + $0x3c] sm:$0xf] %vm795_vm0, %v1000_v49  ;;  %v648_v55 = vsel %vm584_vm1, %v496_v47, %v616_v53 }
 0x125   : > { %827 = vst.msk [vmem:[%s1279_s17 + $0x7c] sm:$0xf] %vm795_vm0, %v1016_v52  ;;  %v998_v56 = vpack.c.bf16 %v648_v55, %v648_v55  ;;  %v664_v57 = vsel %vm600_vm2, %v560_v51, %v632_v54 }
 0x126   : > { %v1014_v58 = vpack.c.bf16 %v664_v57, %v664_v57 }
 0x127   : > { %809 = vst.msk [vmem:[%s1279_s17 + $0x34] sm:$0xf] %vm795_vm0, %v998_v56 }
 0x128   : > { %825 = vst.msk [vmem:[%s1279_s17 + $0x74] sm:$0xf] %vm795_vm0, %v1014_v58 }
 0x129 PF: > { %s13_s14 = sadd.s32 1, %s1175_s14   ;;  %s1387_s12 = smov %s1171_s13 }
 0x12a   : > { %p10_p5 = scmp.ge.s32.totalorder %s13_s14, 4   ;;  %s1388_s13 = smov %s1390_s15 }
 0x12c   :  { %12 = sbr.rel (!%p10_p5) target bundleno = 2 (0x2), region = 62 }

// kernel: discriminator_forward.5
= control target key start
LH: loop header
LB: loop body
LE: loop exit
PB: predicated region body
PF: predicated region fallthrough
CT: control target
= control target key end

     0   :  { %s779_s12 = smov 0   ;;  %s781_s13 = smov 0   ;;  %s884_s0 = inlined_call_operand.vmem [shape: bf16[2,64,128], index: 0, kind: input, shape index: {}]   ;;  %s885_s1 = inlined_call_operand.vmem [shape: bf16[128,16], index: 1, kind: input, shape index: {}]   ;;  %s886_s2 = inlined_call_operand.vmem [shape: f32[1,16], index: 2, kind: input, shape index: {}]   ;;  %s887_s3 = inlined_call_operand.vmem [shape: bf16[2,64,16], index: 3, kind: output, shape index: {}]  }
   0x1   :  { %s783_s14 = smov 0  }
   0x2 LB: > { %s25_s15 = sadd.s32 1, %s753_s13  ;;  %p607_p0 = scmp.ge.s32.totalorder %s757_s14, 1  ;;  %s757_s14 = sphi %s783_s14, %s13_s14   ;;  %s753_s13 = sphi %s781_s13, %s889_s13   ;;  %s749_s12 = sphi %s779_s12, %s888_s12  }
   0x3   : > { %p27_p1 = scmp.ge.s32.totalorder %s25_s15, 2  ;;  %p158_p2 = scmp.lt.s32.totalorder %s757_s14, 3 }
   0x5   : > { %s891_s15 = smov (%p27_p1, %s25_s15), 0  ;;  %p159_p3 = pnand %p607_p0, %p158_p2 }
   0x6   : > { %v721_v0 = vld [vmem:[%s885_s1] sm:$0xff] (!%p159_p3)   ;;  %p191_p4 = scmp.lt.s32.totalorder (!%p159_p3), %s749_s12, 1  ;;  %v722_v1 = vld [vmem:[%s885_s1 + $0x8] sm:$0xff] (!%p159_p3)   ;;  %v723_v2 = vld [vmem:[%s885_s1 + $0x10] sm:$0xff] (!%p159_p3)   ;;  %vm379_vm0 = vcmask (!%p159_p3), 130048   ;;  %vm507_vm1 = vcmask (!%p159_p3), 125952  }
   0x7   : > { %162 = sbr.rel (%p159_p3) target bundleno = 345 (0x159), region = 32  ;;  %657 = vmatprep.subr.bf16.mxu0 (!%p159_p3), %v721_v0  ;;  %681 = vmatprep.subr.bf16.mxu1 (!%p159_p3), %v721_v0  ;;  %v724_v3 = vld [vmem:[%s885_s1 + $0x18] sm:$0xff] (!%p159_p3)   ;;  %v725_v6 = vld [vmem:[%s885_s1 + $0x20] sm:$0xff] (!%p159_p3)   ;;  %v726_v7 = vld [vmem:[%s885_s1 + $0x28] sm:$0xff] (!%p159_p3)  }
   0x8   : > { %658 = vmatpush3.bf16.msra.mxu0 (!%p159_p3), %v721_v0  ;;  %689 = vmatpush3.bf16.msra.mxu1 (!%p159_p3), %v721_v0  ;;  %v727_v8 = vld [vmem:[%s885_s1 + $0x30] sm:$0xff] (!%p159_p3)   ;;  %v728_v9 = vld [vmem:[%s885_s1 + $0x38] sm:$0xff] (!%p159_p3)   ;;  %v612_v12 = vld [vmem:[%s886_s2] ss:$0 sm:$0xff] (!%p159_p3) }
   0x9   : > { %659 = vmatprep.subr.bf16.mxu0 (!%p159_p3), %v722_v1  ;;  %682 = vmatprep.subr.bf16.mxu1 (!%p159_p3), %v722_v1 }
   0xc   : > { %660 = vmatpush3.bf16.msra.mxu0 (!%p159_p3), %v722_v1  ;;  %690 = vmatpush3.bf16.msra.mxu1 (!%p159_p3), %v722_v1 }
   0xd   : > { %661 = vmatprep.subr.bf16.mxu0 (!%p159_p3), %v723_v2  ;;  %683 = vmatprep.subr.bf16.mxu1 (!%p159_p3), %v723_v2 }
   0xe   : > { %s893_s12 = smov (!%p191_p4, %s749_s12), 1 }
   0xf   : > { %s635_s22 = sshll.u32 %s893_s12, 5 }
  0x10   : > { %s814_s25 = scalar_lea.vmem %s884_s0, %s635_s22  ;;  %662 = vmatpush3.bf16.msra.mxu0 %v723_v2  ;;  %691 = vmatpush3.bf16.msra.mxu1 %v723_v2  ;;  %s208_s17 = scalar_lea.vmem %s887_s3, %s635_s22 }
  0x11   : > { %v729_v4 = vld [vmem:[%s814_s25] sm:$0xff]   ;;  %v731_v5 = vld [vmem:[%s814_s25 + $0x10] sm:$0xff]   ;;  %663 = vmatprep.subr.bf16.mxu0 %v724_v3  ;;  %684 = vmatprep.subr.bf16.mxu1 %v724_v3  ;;  %v730_v10 = vld [vmem:[%s814_s25 + $0x8] sm:$0xff]  }
  0x12   : > { %673 = vmatprep.mubr.bf16.mxu0 %v729_v4  ;;  %677 = vmatprep.mubr.bf16.mxu1 %v731_v5  ;;  %v732_v11 = vld [vmem:[%s814_s25 + $0x18] sm:$0xff]  }
  0x14   : > { %664 = vmatpush3.bf16.msra.mxu0 %v724_v3  ;;  %692 = vmatpush3.bf16.msra.mxu1 %v724_v3 }
  0x15   : > { %665 = vmatprep.subr.bf16.mxu0 %v725_v6  ;;  %685 = vmatprep.subr.bf16.mxu1 %v725_v6 }
  0x18   : > { %666 = vmatpush3.bf16.msra.mxu0 %v725_v6  ;;  %693 = vmatpush3.bf16.msra.mxu1 %v725_v6 }
  0x19   : > { %667 = vmatprep.subr.bf16.mxu0 %v726_v7  ;;  %686 = vmatprep.subr.bf16.mxu1 %v726_v7 }
  0x1c   : > { %668 = vmatpush3.bf16.msra.mxu0 %v726_v7  ;;  %694 = vmatpush3.bf16.msra.mxu1 %v726_v7 }
  0x1d   : > { %669 = vmatprep.subr.bf16.mxu0 %v727_v8  ;;  %687 = vmatprep.subr.bf16.mxu1 %v727_v8 }
  0x20   : > { %670 = vmatpush3.bf16.msra.mxu0 %v727_v8  ;;  %695 = vmatpush3.bf16.msra.mxu1 %v727_v8 }
  0x21   : > { %671 = vmatprep.subr.bf16.mxu0 %v728_v9  ;;  %688 = vmatprep.subr.bf16.mxu1 %v728_v9 }
  0x24   : > { %672 = vmatpush3.bf16.msra.mxu0 %v728_v9  ;;  %696 = vmatpush3.bf16.msra.mxu1 %v728_v9 }
  0x27   : > { %674 = vmatmul.mubr.bf16.vlgmr.msra.gmra.mrb[0].mxu0 %v730_v10  ;;  %678 = vmatmul.mubr.bf16.vlgmr.msra.gmra.mrb[0].mxu1 %v732_v11 }
  0xfa   : > { %v675_v13 = vpop.f32.mrb[0].mxu0  ;;  %v679_v14 = vpop.f32.mrb[0].mxu1 }
  0xfb   : > { %v348_v15 = vpop.f32.mrb[1].mxu0  ;;  %v364_v16 = vpop.f32.mrb[1].mxu1  ;;  %v357_v22 = vadd.f32 %v675_v13, %v612_v12  ;;  %v373_v35 = vadd.f32 %v679_v14, %v612_v12 }
  0xfc   : > { %v349_v17 = vadd.f32 %v612_v12, %v348_v15  ;;  %v676_v18 = vpop.f32.mrb[2].mxu0  ;;  %v680_v19 = vpop.f32.mrb[2].mxu1  ;;  %v365_v27 = vadd.f32 %v612_v12, %v364_v16 }
  0xfd   : > { %v351_v20 = vpop.f32.mrb[3].mxu0  ;;  %v367_v21 = vpop.f32.mrb[3].mxu1  ;;  %v360_v25 = vadd.f32 %v676_v18, %v612_v12  ;;  %v383_v29 = vsel %vm379_vm0, %v357_v22, 0.0  ;;  %v376_v37 = vadd.f32 %v680_v19, %v612_v12  ;;  %v391_v40 = vsel %vm379_vm0, %v373_v35, 0.0 }
  0xfe   : > { %v352_v23 = vadd.f32 %v612_v12, %v351_v20  ;;  %v380_v24 = vsel %vm379_vm0, %v349_v17, 0.0  ;;  %v387_v32 = vsel %vm379_vm0, %v365_v27, 0.0  ;;  %v368_v33 = vadd.f32 %v612_v12, %v367_v21 }
  0xff   : > { %v385_v31 = vsel %vm379_vm0, %v360_v25, 0.0  ;;  %v393_v42 = vsel %vm379_vm0, %v376_v37, 0.0 }
 0x100   : > { %v381_v26 = vsel %vm379_vm0, %v352_v23, 0.0  ;;  %v389_v38 = vsel %vm379_vm0, %v368_v33, 0.0 }
 0x101   : > { %v382_v28 = vadd.f32 %v381_v26, %v380_v24 }
 0x103   : > { %v384_v30 = vadd.f32 %v383_v29, %v382_v28 }
 0x105   : > { %v386_v34 = vadd.f32 %v385_v31, %v384_v30 }
 0x107   : > { %v388_v36 = vadd.f32 %v387_v32, %v386_v34 }
 0x109   : > { %v390_v39 = vadd.f32 %v389_v38, %v388_v36 }
 0x10b   : > { %v392_v41 = vadd.f32 %v391_v40, %v390_v39 }
 0x10d   : > { %v394_v43 = vadd.f32 %v393_v42, %v392_v41 }
 0x10f   : > { %v395_v44 = vrot.slane %v394_v43, 4 }
 0x111   : > { %v396_v45 = vadd.f32 %v395_v44, %v394_v43 }
 0x113   : > { %v397_v46 = vrot.slane %v396_v45, 2 }
 0x115   : > { %v398_v47 = vadd.f32 %v397_v46, %v396_v45 }
 0x117   : > { %v399_v48 = vrot.slane %v398_v47, 1 }
 0x119   : > { %v400_v49 = vadd.f32 %v399_v48, %v398_v47 }
 0x11b   : > { %v402_v50 = vmul.f32 0.015625, %v400_v49 }
 0x11d   : > { %v403_v51 = vsub.f32 %v349_v17, %v402_v50  ;;  %v404_v52 = vsub.f32 %v352_v23, %v402_v50  ;;  %v405_v53 = vsub.f32 %v357_v22, %v402_v50  ;;  %v406_v54 = vsub.f32 %v360_v25, %v402_v50 }
 0x11e   : > { %v407_v55 = vsub.f32 %v365_v27, %v402_v50  ;;  %v408_v56 = vsub.f32 %v368_v33, %v402_v50  ;;  %v409_v57 = vsub.f32 %v373_v35, %v402_v50  ;;  %v410_v58 = vsub.f32 %v376_v37, %v402_v50 }
 0x11f   : > { %v411_v59 = vmul.f32 %v403_v51, %v403_v51  ;;  %v412_v60 = vmul.f32 %v404_v52, %v404_v52  ;;  %v413_v61 = vmul.f32 %v405_v53, %v405_v53  ;;  %v414_v62 = vmul.f32 %v406_v54, %v406_v54 }
 0x120   : > { %v415_v2 = vmul.f32 %v407_v55, %v407_v55  ;;  %v416_v5 = vmul.f32 %v408_v56, %v408_v56  ;;  %v417_v8 = vmul.f32 %v409_v57, %v409_v57  ;;  %v418_v11 = vmul.f32 %v410_v58, %v410_v58 }
 0x121   : > { %v419_v63 = vsel %vm379_vm0, %v411_v59, 0.0  ;;  %v420_v0 = vsel %vm379_vm0, %v412_v60, 0.0  ;;  %v422_v3 = vsel %vm379_vm0, %v413_v61, 0.0  ;;  %v424_v6 = vsel %vm379_vm0, %v414_v62, 0.0 }
 0x122   : > { %v421_v1 = vadd.f32 %v420_v0, %v419_v63  ;;  %v426_v9 = vsel %vm379_vm0, %v415_v2, 0.0  ;;  %v428_v12 = vsel %vm379_vm0, %v416_v5, 0.0  ;;  %v430_v14 = vsel %vm379_vm0, %v417_v8, 0.0 }
 0x123   : > { %v432_v16 = vsel %vm379_vm0, %v418_v11, 0.0 }
 0x124   : > { %v423_v4 = vadd.f32 %v422_v3, %v421_v1 }
 0x126   : > { %v425_v7 = vadd.f32 %v424_v6, %v423_v4 }
 0x128   : > { %v427_v10 = vadd.f32 %v426_v9, %v425_v7 }
 0x12a   : > { %v429_v13 = vadd.f32 %v428_v12, %v427_v10 }
 0x12c   : > { %v431_v15 = vadd.f32 %v430_v14, %v429_v13 }
 0x12e   : > { %v433_v17 = vadd.f32 %v432_v16, %v431_v15 }
 0x130   : > { %v434_v18 = vrot.slane %v433_v17, 4 }
 0x132   : > { %v435_v19 = vadd.f32 %v434_v18, %v433_v17 }
 0x134   : > { %v436_v20 = vrot.slane %v435_v19, 2 }
 0x136   : > { %v437_v21 = vadd.f32 %v436_v20, %v435_v19 }
 0x138   : > { %v438_v22 = vrot.slane %v437_v21, 1 }
 0x13a   : > { %v439_v23 = vadd.f32 %v438_v22, %v437_v21 }
 0x13c   : > { %v440_v24 = vmul.f32 0.015625, %v439_v23 }
 0x13e   : > { %v441_v25 = vadd.f32 1e-05, %v440_v24 }
 0x140   : > { %733 = vrsqrt.f32 %v441_v25 }
 0x14a   : > { %v734_v26 = vpop.eup %733 }
 0x14b   : > { %v443_v27 = vmul.f32 %v734_v26, %v403_v51  ;;  %v444_v28 = vmul.f32 %v734_v26, %v404_v52  ;;  %v445_v29 = vmul.f32 %v734_v26, %v405_v53  ;;  %v446_v30 = vmul.f32 %v734_v26, %v406_v54 }
 0x14c   : > { %v447_v31 = vmul.f32 %v734_v26, %v407_v55  ;;  %v448_v32 = vmul.f32 %v734_v26, %v408_v56  ;;  %v449_v33 = vmul.f32 %v734_v26, %v409_v57  ;;  %v450_v34 = vmul.f32 %v734_v26, %v410_v58 }
 0x14d   : > { %vm451_vm2 = vcmp.ge.f32.partialorder %v443_v27, 0.0  ;;  %vm452_vm3 = vcmp.ge.f32.partialorder %v444_v28, 0.0  ;;  %vm453_vm4 = vcmp.ge.f32.partialorder %v445_v29, 0.0  ;;  %vm454_vm5 = vcmp.ge.f32.partialorder %v446_v30, 0.0 }
 0x14e   : > { %vm455_vm6 = vcmp.ge.f32.partialorder %v447_v31, 0.0  ;;  %vm456_vm7 = vcmp.ge.f32.partialorder %v448_v32, 0.0  ;;  %vm457_vm8 = vcmp.ge.f32.partialorder %v449_v33, 0.0  ;;  %vm458_vm9 = vcmp.ge.f32.partialorder %v450_v34, 0.0 }
 0x14f   : > { %v459_v35 = vmul.f32 0.2, %v443_v27  ;;  %v460_v36 = vmul.f32 0.2, %v444_v28  ;;  %v461_v37 = vmul.f32 0.2, %v445_v29 }
 0x150   : > { %v462_v38 = vmul.f32 0.2, %v446_v30  ;;  %v463_v39 = vmul.f32 0.2, %v447_v31  ;;  %v464_v40 = vmul.f32 0.2, %v448_v32 }
 0x151   : > { %v465_v41 = vmul.f32 0.2, %v449_v33  ;;  %v466_v42 = vmul.f32 0.2, %v450_v34  ;;  %v467_v43 = vsel %vm451_vm2, %v443_v27, %v459_v35  ;;  %v468_v44 = vsel %vm452_vm3, %v444_v28, %v460_v36 }
 0x152   : > { %v469_v45 = vsel %vm453_vm4, %v445_v29, %v461_v37  ;;  %v470_v46 = vsel %vm454_vm5, %v446_v30, %v462_v38  ;;  %v471_v47 = vsel %vm455_vm6, %v447_v31, %v463_v39  ;;  %v472_v48 = vsel %vm456_vm7, %v448_v32, %v464_v40 }
 0x153   : > { %v473_v49 = vsel %vm457_vm8, %v449_v33, %v465_v41  ;;  %v474_v50 = vsel %vm458_vm9, %v450_v34, %v466_v42  ;;  %v637_v51 = vpack.c.bf16 %v467_v43, %v467_v43  ;;  %v638_v52 = vpack.c.bf16 %v468_v44, %v468_v44 }
 0x154   : > { %v639_v53 = vpack.c.bf16 %v469_v45, %v469_v45  ;;  %v640_v54 = vpack.c.bf16 %v470_v46, %v470_v46  ;;  %v641_v55 = vpack.c.bf16 %v471_v47, %v471_v47  ;;  %v642_v56 = vpack.c.bf16 %v472_v48, %v472_v48 }
 0x155   : > { %v643_v57 = vpack.c.bf16 %v473_v49, %v473_v49  ;;  %v644_v58 = vpack.c.bf16 %v474_v50, %v474_v50  ;;  %508 = vst.msk [vmem:[%s208_s17] sm:$0xf] %vm507_vm1, %v637_v51  ;;  %509 = vst.msk [vmem:[%s208_s17 + $0x4] sm:$0xf] %vm507_vm1, %v638_v52 }
 0x156   : > { %510 = vst.msk [vmem:[%s208_s17 + $0x8] sm:$0xf] %vm507_vm1, %v639_v53  ;;  %511 = vst.msk [vmem:[%s208_s17 + $0xc] sm:$0xf] %vm507_vm1, %v640_v54 }
 0x157   : > { %512 = vst.msk [vmem:[%s208_s17 + $0x10] sm:$0xf] %vm507_vm1, %v641_v55  ;;  %513 = vst.msk [vmem:[%s208_s17 + $0x14] sm:$0xf] %vm507_vm1, %v642_v56 }
 0x158   : > { %514 = vst.msk [vmem:[%s208_s17 + $0x18] sm:$0xf] %vm507_vm1, %v643_v57  ;;  %515 = vst.msk [vmem:[%s208_s17 + $0x1c] sm:$0xf] %vm507_vm1, %v644_v58 }
 0x159 PF: > { %s13_s14 = sadd.s32 1, %s757_s14   ;;  %s888_s12 = smov %s753_s13 }
 0x15a   : > { %p10_p5 = scmp.ge.s32.totalorder %s13_s14, 4   ;;  %s889_s13 = smov %s891_s15 }
 0x15c   :  { %12 = sbr.rel (!%p10_p5) target bundleno = 2 (0x2), region = 62 }

// kernel: discriminator_forward.6
= control target key start
LH: loop header
LB: loop body
LE: loop exit
PB: predicated region body
PF: predicated region fallthrough
CT: control target
= control target key end

     0   :  { %s686_s12 = smov 0   ;;  %s688_s13 = smov 0   ;;  %s778_s0 = inlined_call_operand.vmem [shape: bf16[2,16,256], index: 0, kind: input, shape index: {}]   ;;  %s779_s1 = inlined_call_operand.vmem [shape: bf16[256,32], index: 1, kind: input, shape index: {}]   ;;  %s780_s2 = inlined_call_operand.vmem [shape: f32[1,32], index: 2, kind: input, shape index: {}]   ;;  %s781_s3 = inlined_call_operand.vmem [shape: bf16[2,16,32], index: 3, kind: output, shape index: {}]  }
   0x1   :  { %s690_s14 = smov 0  }
   0x2 LB: > { %s25_s15 = sadd.s32 1, %s660_s13  ;;  %p543_p0 = scmp.ge.s32.totalorder %s664_s14, 1  ;;  %s664_s14 = sphi %s690_s14, %s13_s14   ;;  %s660_s13 = sphi %s688_s13, %s783_s13   ;;  %s656_s12 = sphi %s686_s12, %s782_s12  }
   0x3   : > { %p27_p1 = scmp.ge.s32.totalorder %s25_s15, 2  ;;  %p159_p2 = scmp.lt.s32.totalorder %s664_s14, 3 }
   0x5   : > { %s785_s15 = smov (%p27_p1, %s25_s15), 0  ;;  %p160_p3 = pnand %p543_p0, %p159_p2 }
   0x6   : > { %v621_v0 = vld [vmem:[%s779_s1 + $0x40] sm:$0xff] (!%p160_p3)   ;;  %v623_v2 = vld [vmem:[%s779_s1 + $0x48] sm:$0xff] (!%p160_p3)   ;;  %p193_p4 = scmp.lt.s32.totalorder (!%p160_p3), %s656_s12, 1  ;;  %v625_v4 = vld [vmem:[%s779_s1 + $0x50] sm:$0xff] (!%p160_p3)   ;;  %vm402_vm0 = vcmask (!%p160_p3), 261120   ;;  %vm446_vm3 = vcmask (!%p160_p3), 257024  }
   0x7   : > { %163 = sbr.rel (%p160_p3) target bundleno = 317 (0x13d), region = 32  ;;  %v622_v1 = vld [vmem:[%s779_s1] sm:$0xff] (!%p160_p3)   ;;  %575 = vmatprep.subr.bf16.mxu0 (!%p160_p3), %v621_v0  ;;  %v624_v3 = vld [vmem:[%s779_s1 + $0x8] sm:$0xff] (!%p160_p3)   ;;  %v626_v5 = vld [vmem:[%s779_s1 + $0x10] sm:$0xff] (!%p160_p3)  }
   0x8   : > { %576 = vmatpush3.bf16.msra.mxu0 (!%p160_p3), %v622_v1  ;;  %v627_v6 = vld [vmem:[%s779_s1 + $0x58] sm:$0xff] (!%p160_p3)   ;;  %v629_v8 = vld [vmem:[%s779_s1 + $0x60] sm:$0xff] (!%p160_p3)   ;;  %v631_v10 = vld [vmem:[%s779_s1 + $0x68] sm:$0xff] (!%p160_p3)  }
   0x9   : > { %577 = vmatprep.subr.bf16.mxu0 (!%p160_p3), %v623_v2  ;;  %v628_v7 = vld [vmem:[%s779_s1 + $0x18] sm:$0xff] (!%p160_p3)   ;;  %v630_v9 = vld [vmem:[%s779_s1 + $0x20] sm:$0xff] (!%p160_p3)   ;;  %v632_v12 = vld [vmem:[%s779_s1 + $0x28] sm:$0xff] (!%p160_p3)  }
   0xa   : > { %v633_v13 = vld [vmem:[%s779_s1 + $0x70] sm:$0xff] (!%p160_p3)   ;;  %v635_v15 = vld [vmem:[%s779_s1 + $0x78] sm:$0xff] (!%p160_p3)   ;;  %v548_v19 = vld [vmem:[%s780_s2] ss:$0 sm:$0xff] (!%p160_p3) }
   0xb   : > { %v634_v14 = vld [vmem:[%s779_s1 + $0x30] sm:$0xff] (!%p160_p3)   ;;  %v636_v16 = vld [vmem:[%s779_s1 + $0x38] sm:$0xff] (!%p160_p3)  }
   0xc   : > { %578 = vmatpush3.bf16.msra.mxu0 (!%p160_p3), %v624_v3 }
   0xd   : > { %579 = vmatprep.subr.bf16.mxu0 (!%p160_p3), %v625_v4 }
   0xe   : > { %s787_s12 = smov (!%p193_p4, %s656_s12), 1 }
   0xf   : > { %s571_s5 = sshll.u32 %s787_s12, 4  ;;  %s572_s4 = sshll.u32 %s787_s12, 3 }
  0x10   : > { %580 = vmatpush3.bf16.msra.mxu0 %v626_v5  ;;  %s201_s10 = scalar_lea.vmem %s778_s0, %s571_s5  ;;  %s211_s7 = scalar_lea.vmem %s781_s3, %s572_s4 }
  0x11   : > { %581 = vmatprep.subr.bf16.mxu0 %v627_v6  ;;  %v639_v11 = vld [vmem:[%s201_s10 + $0x4] ss:$8 sps:$4 sm:$0xff]   ;;  %v637_v17 = vld [vmem:[%s201_s10] ss:$8 sps:$4 sm:$0xff]  }
  0x12   : > { %393 = vmatprep.mubr.bf16.mxu0 %v639_v11 }
  0x14   : > { %582 = vmatpush3.bf16.msra.mxu0 %v628_v7 }
  0x15   : > { %583 = vmatprep.subr.bf16.mxu0 %v629_v8 }
  0x18   : > { %584 = vmatpush3.bf16.msra.mxu0 %v630_v9 }
  0x19   : > { %585 = vmatprep.subr.bf16.mxu0 %v631_v10 }
  0x1c   : > { %586 = vmatpush3.bf16.msra.mxu0 %v632_v12 }
  0x1d   : > { %587 = vmatprep.subr.bf16.mxu0 %v633_v13 }
  0x20   : > { %588 = vmatpush3.bf16.msra.mxu0 %v634_v14 }
  0x21   : > { %589 = vmatprep.subr.bf16.mxu0 %v635_v15 }
  0x24   : > { %590 = vmatpush3.bf16.msra.mxu0 %v636_v16 }
  0x27   : > { %394 = vmatmul.mubr.bf16.vlgmr.msra.gmra.mrb[0].mxu0 %v637_v17 }
  0xfa   : > { %v591_v18 = vpop.f32.mrb[0].mxu0 }
  0xfb   : > { %v592_v20 = vpop.f32.mrb[1].mxu0 }
  0xfc   : > { %v593_v21 = vadd.f32 %v592_v20, %v591_v18  ;;  %v594_v22 = vpop.f32.mrb[2].mxu0 }
  0xfd   : > { %v595_v23 = vpop.f32.mrb[3].mxu0 }
  0xfe   : > { %v396_v24 = vadd.f32 %v593_v21, %v548_v19  ;;  %v596_v25 = vadd.f32 %v595_v23, %v594_v22 }
 0x100   : > { %v399_v26 = vadd.f32 %v596_v25, %v548_v19  ;;  %v403_v27 = vsel %vm402_vm0, %v396_v24, 0.0 }
 0x102   : > { %v404_v28 = vsel %vm402_vm0, %v399_v26, 0.0 }
 0x103   : > { %v405_v29 = vadd.f32 %v404_v28, %v403_v27 }
 0x105   : > { %v406_v30 = vrot.slane %v405_v29, 4 }
 0x107   : > { %v407_v31 = vadd.f32 %v406_v30, %v405_v29 }
 0x109   : > { %v408_v32 = vrot.slane %v407_v31, 2 }
 0x10b   : > { %v409_v33 = vadd.f32 %v408_v32, %v407_v31 }
 0x10d   : > { %v410_v34 = vrot.slane %v409_v33, 1 }
 0x10f   : > { %v411_v35 = vadd.f32 %v410_v34, %v409_v33 }
 0x111   : > { %v413_v36 = vmul.f32 0.0625, %v411_v35 }
 0x113   : > { %v414_v37 = vsub.f32 %v396_v24, %v413_v36  ;;  %v415_v38 = vsub.f32 %v399_v26, %v413_v36 }
 0x115   : > { %v416_v39 = vmul.f32 %v414_v37, %v414_v37  ;;  %v417_v40 = vmul.f32 %v415_v38, %v415_v38 }
 0x117   : > { %v418_v41 = vsel %vm402_vm0, %v416_v39, 0.0  ;;  %v419_v42 = vsel %vm402_vm0, %v417_v40, 0.0 }
 0x118   : > { %v420_v43 = vadd.f32 %v419_v42, %v418_v41 }
 0x11a   : > { %v421_v44 = vrot.slane %v420_v43, 4 }
 0x11c   : > { %v422_v45 = vadd.f32 %v421_v44, %v420_v43 }
 0x11e   : > { %v423_v46 = vrot.slane %v422_v45, 2 }
 0x120   : > { %v424_v47 = vadd.f32 %v423_v46, %v422_v45 }
 0x122   : > { %v425_v48 = vrot.slane %v424_v47, 1 }
 0x124   : > { %v426_v49 = vadd.f32 %v425_v48, %v424_v47 }
 0x126   : > { %v427_v50 = vmul.f32 0.0625, %v426_v49 }
 0x128   : > { %v428_v51 = vadd.f32 1e-05, %v427_v50 }
 0x12a   : > { %640 = vrsqrt.f32 %v428_v51 }
 0x134   : > { %v641_v52 = vpop.eup %640 }
 0x135   : > { %v430_v53 = vmul.f32 %v641_v52, %v414_v37  ;;  %v431_v54 = vmul.f32 %v641_v52, %v415_v38 }
 0x137   : > { %vm432_vm1 = vcmp.ge.f32.partialorder %v430_v53, 0.0  ;;  %vm433_vm2 = vcmp.ge.f32.partialorder %v431_v54, 0.0  ;;  %v434_v55 = vmul.f32 0.2, %v430_v53  ;;  %v435_v56 = vmul.f32 0.2, %v431_v54 }
 0x139   : > { %v436_v57 = vsel %vm432_vm1, %v430_v53, %v434_v55  ;;  %v437_v58 = vsel %vm433_vm2, %v431_v54, %v435_v56 }
 0x13a   : > { %v573_v59 = vpack.c.bf16 %v436_v57, %v436_v57  ;;  %v574_v60 = vpack.c.bf16 %v437_v58, %v437_v58 }
 0x13c   : > { %447 = vst.msk [vmem:[%s211_s7] sm:$0xf] %vm446_vm3, %v573_v59  ;;  %448 = vst.msk [vmem:[%s211_s7 + $0x4] sm:$0xf] %vm446_vm3, %v574_v60 }
 0x13d PF: > { %s13_s14 = sadd.s32 1, %s664_s14   ;;  %s782_s12 = smov %s660_s13 }
 0x13e   : > { %p10_p5 = scmp.ge.s32.totalorder %s13_s14, 4   ;;  %s783_s13 = smov %s785_s15 }
 0x140   :  { %12 = sbr.rel (!%p10_p5) target bundleno = 2 (0x2), region = 62 }

// kernel: discriminator_forward.7
= control target key start
LH: loop header
LB: loop body
LE: loop exit
PB: predicated region body
PF: predicated region fallthrough
CT: control target
= control target key end

     0   :  { %s848_s14 = smov 0   ;;  %s850_s15 = smov 0   ;;  %s985_s0 = inlined_call_operand.vmem [shape: bf16[2,4,512], index: 0, kind: input, shape index: {}]   ;;  %s986_s1 = inlined_call_operand.vmem [shape: bf16[512,1], index: 1, kind: input, shape index: {}]   ;;  %s987_s2 = inlined_call_operand.<no memory space> [shape: f32[1,1], index: 2, kind: input, shape index: {}]   ;;  %s988_s3 = inlined_call_operand.vmem [shape: f32[2,4,1], index: 3, kind: output, shape index: {}]  }
   0x1   :  { %v8_v0 = vstv %s987_s2  ;;  %s852_s16 = smov 0  }
   0x2   :  { %9 = vst [vmem:[#allocation2] sm:$0x1] %v8_v0 }
   0x3 LB: > { %s27_s2 = sadd.s32 1, %s818_s15  ;;  %p658_p0 = scmp.ge.s32.totalorder %s822_s16, 1  ;;  %s822_s16 = sphi %s852_s16, %s15_s16   ;;  %s818_s15 = sphi %s850_s15, %s990_s15   ;;  %s814_s14 = sphi %s848_s14, %s989_s14  }
   0x4   : > { %p29_p1 = scmp.ge.s32.totalorder %s27_s2, 2  ;;  %p159_p2 = scmp.lt.s32.totalorder %s822_s16, 3 }
   0x6   : > { %s992_s2 = smov (%p29_p1, %s27_s2), 0  ;;  %p160_p3 = pnand %p658_p0, %p159_p2 }
   0x7   : > { %v767_v1 = vld [vmem:[%s986_s1 + $0x40] sm:$0xff] (!%p160_p3)   ;;  %v771_v5 = vld [vmem:[%s986_s1 + $0x48] sm:$0xff] (!%p160_p3)   ;;  %v775_v9 = vld [vmem:[%s986_s1 + $0x50] sm:$0xff] (!%p160_p3)   ;;  %p189_p4 = scmp.lt.s32.totalorder (!%p160_p3), %s814_s14, 1  ;;  %v283_v31 = vlaneseq (!%p160_p3)  ;;  %v824_v35 = vmov (!%p160_p3), 1983009808  }
   0x8   : > { %163 = sbr.rel (%p160_p3) target bundleno = 261 (0x105), region = 32  ;;  %v768_v2 = vld [vmem:[%s986_s1 + $0xc0] sm:$0xff] (!%p160_p3)   ;;  %698 = vmatprep.subr.bf16.mxu0 (!%p160_p3), %v767_v1  ;;  %v772_v6 = vld [vmem:[%s986_s1 + $0xc8] sm:$0xff] (!%p160_p3)   ;;  %v776_v10 = vld [vmem:[%s986_s1 + $0xd0] sm:$0xff] (!%p160_p3)   ;;  %v281_v36 = vunpack.c.l.s4 (!%p160_p3), %v824_v35  ;;  %vm572_vm0 = vcmask (!%p160_p3), 3072  }
   0x9   : > { %v769_v3 = vld [vmem:[%s986_s1] sm:$0xff] (!%p160_p3)   ;;  %720 = vmatprep.subr.bf16.mxu1 (!%p160_p3), %v768_v2  ;;  %v773_v7 = vld [vmem:[%s986_s1 + $0x8] sm:$0xff] (!%p160_p3)   ;;  %v777_v11 = vld [vmem:[%s986_s1 + $0x10] sm:$0xff] (!%p160_p3)   ;;  %v284_v37 = vshrl.u32 (!%p160_p3), %v283_v31, 7 }
   0xa   : > { %v770_v4 = vld [vmem:[%s986_s1 + $0x80] sm:$0xff] (!%p160_p3)   ;;  %699 = vmatpush3.bf16.msra.mxu0 (!%p160_p3), %v769_v3  ;;  %v774_v8 = vld [vmem:[%s986_s1 + $0x88] sm:$0xff] (!%p160_p3)   ;;  %v778_v12 = vld [vmem:[%s986_s1 + $0x90] sm:$0xff] (!%p160_p3)   ;;  %v282_v38 = vunpack.c.0.s8 (!%p160_p3), %v281_v36 }
   0xb   : > { %721 = vmatpush3.bf16.msra.mxu1 (!%p160_p3), %v770_v4  ;;  %700 = vmatprep.subr.bf16.mxu0 (!%p160_p3), %v771_v5  ;;  %v779_v13 = vld [vmem:[%s986_s1 + $0x58] sm:$0xff] (!%p160_p3)   ;;  %v783_v17 = vld [vmem:[%s986_s1 + $0x60] sm:$0xff] (!%p160_p3)   ;;  %v787_v21 = vld [vmem:[%s986_s1 + $0x68] sm:$0xff] (!%p160_p3)  }
   0xc   : > { %722 = vmatprep.subr.bf16.mxu1 (!%p160_p3), %v772_v6  ;;  %v780_v14 = vld [vmem:[%s986_s1 + $0xd8] sm:$0xff] (!%p160_p3)   ;;  %v784_v18 = vld [vmem:[%s986_s1 + $0xe0] sm:$0xff] (!%p160_p3)   ;;  %v788_v22 = vld [vmem:[%s986_s1 + $0xe8] sm:$0xff] (!%p160_p3)   ;;  %v285_v40 = vsub.s32 (!%p160_p3), %v282_v38, %v284_v37 }
   0xd   : > { %v781_v15 = vld [vmem:[%s986_s1 + $0x18] sm:$0xff] (!%p160_p3)   ;;  %v785_v19 = vld [vmem:[%s986_s1 + $0x20] sm:$0xff] (!%p160_p3)   ;;  %v789_v23 = vld [vmem:[%s986_s1 + $0x28] sm:$0xff] (!%p160_p3)  }
   0xe   : > { %701 = vmatpush3.bf16.msra.mxu0 (!%p160_p3), %v773_v7  ;;  %v782_v16 = vld [vmem:[%s986_s1 + $0x98] sm:$0xff] (!%p160_p3)   ;;  %v786_v20 = vld [vmem:[%s986_s1 + $0xa0] sm:$0xff] (!%p160_p3)   ;;  %v790_v24 = vld [vmem:[%s986_s1 + $0xa8] sm:$0xff] (!%p160_p3)  }
   0xf   : > { %723 = vmatpush3.bf16.msra.mxu1 %v774_v8  ;;  %702 = vmatprep.subr.bf16.mxu0 %v775_v9  ;;  %s994_s14 = smov (!%p189_p4, %s814_s14), 1  ;;  %v791_v25 = vld [vmem:[%s986_s1 + $0x70] sm:$0xff]   ;;  %v795_v29 = vld [vmem:[%s986_s1 + $0x78] sm:$0xff]   ;;  %v662_v47 = vld [vmem:[#allocation2] ss:$0 sm:$0xff] }
  0x10   : > { %724 = vmatprep.subr.bf16.mxu1 %v776_v10  ;;  %v792_v26 = vld [vmem:[%s986_s1 + $0xf0] sm:$0xff]   ;;  %s697_s23 = sshll.u32 %s994_s14, 3  ;;  %v796_v30 = vld [vmem:[%s986_s1 + $0xf8] sm:$0xff]   ;;  %s661_s10 = sshll.u32 %s994_s14, 2 }
  0x11   : > { %v793_v27 = vld [vmem:[%s986_s1 + $0x30] sm:$0xff]   ;;  %s197_s5 = scalar_lea.vmem %s985_s0, %s697_s23  ;;  %v797_v32 = vld [vmem:[%s986_s1 + $0x38] sm:$0xff]   ;;  %s204_s13 = scalar_lea.vmem %s988_s3, %s661_s10 }
  0x12   : > { %703 = vmatpush3.bf16.msra.mxu0 %v777_v11  ;;  %v794_v28 = vld [vmem:[%s986_s1 + $0xb0] sm:$0xff]   ;;  %v798_v33 = vld [vmem:[%s986_s1 + $0xb8] sm:$0xff]   ;;  %v206_v34 = vld [vmem:[%s197_s5] sm:$0xff] }
  0x13   : > { %725 = vmatpush3.bf16.msra.mxu1 %v778_v12  ;;  %704 = vmatprep.subr.bf16.mxu0 %v779_v13  ;;  %v279_v39 = vcombine.high %v206_v34, %v206_v34  ;;  %v286_v41 = vrot.slane %v206_v34, %v285_v40 }
  0x14   : > { %726 = vmatprep.subr.bf16.mxu1 %v780_v14 }
  0x15   : > { %v293_v42 = vrot.slane %v279_v39, %v285_v40  ;;  %v294_v43 = vcombine.high %v286_v41, %v286_v41 }
  0x16   : > { %705 = vmatpush3.bf16.msra.mxu0 %v781_v15 }
  0x17   : > { %727 = vmatpush3.bf16.msra.mxu1 %v782_v16  ;;  %706 = vmatprep.subr.bf16.mxu0 %v783_v17  ;;  %v295_v44 = vcombine.high %v293_v42, %v293_v42 }
  0x18   : > { %728 = vmatprep.subr.bf16.mxu1 %v784_v18  ;;  %524 = vmatprep.mubr.bf16.mxu0 %v294_v43 }
  0x19   : > { %564 = vmatprep.mubr.bf16.mxu1 %v295_v44 }
  0x1a   : > { %707 = vmatpush3.bf16.msra.mxu0 %v785_v19 }
  0x1b   : > { %729 = vmatpush3.bf16.msra.mxu1 %v786_v20  ;;  %708 = vmatprep.subr.bf16.mxu0 %v787_v21 }
  0x1c   : > { %730 = vmatprep.subr.bf16.mxu1 %v788_v22 }
  0x1e   : > { %709 = vmatpush3.bf16.msra.mxu0 %v789_v23 }
  0x1f   : > { %731 = vmatpush3.bf16.msra.mxu1 %v790_v24  ;;  %710 = vmatprep.subr.bf16.mxu0 %v791_v25 }
  0x20   : > { %732 = vmatprep.subr.bf16.mxu1 %v792_v26 }
  0x22   : > { %711 = vmatpush3.bf16.msra.mxu0 %v793_v27 }
  0x23   : > { %733 = vmatpush3.bf16.msra.mxu1 %v794_v28  ;;  %712 = vmatprep.subr.bf16.mxu0 %v795_v29 }
  0x24   : > { %734 = vmatprep.subr.bf16.mxu1 %v796_v30 }
  0x26   : > { %713 = vmatpush3.bf16.msra.mxu0 %v797_v32 }
  0x27   : > { %735 = vmatpush3.bf16.msra.mxu1 %v798_v33 }
  0x29   : > { %525 = vmatmul.mubr.bf16.vlgmr.msra.gmra.mrb[0].mxu0 %v286_v41 }
  0x2a   : > { %565 = vmatmul.mubr.bf16.vlgmr.msra.gmra.mrb[0].mxu1 %v293_v42 }
  0xfc   : > { %v714_v45 = vpop.f32.mrb[0].mxu0 }
  0xfd   : > { %v736_v46 = vpop.f32.mrb[0].mxu1  ;;  %v715_v48 = vpop.f32.mrb[1].mxu0 }
  0xfe   : > { %v737_v49 = vpop.f32.mrb[1].mxu1  ;;  %v716_v50 = vadd.f32 %v715_v48, %v714_v45  ;;  %v717_v52 = vpop.f32.mrb[2].mxu0 }
  0xff   : > { %v738_v51 = vadd.f32 %v737_v49, %v736_v46  ;;  %v739_v53 = vpop.f32.mrb[2].mxu1  ;;  %v718_v54 = vpop.f32.mrb[3].mxu0 }
 0x100   : > { %v740_v55 = vpop.f32.mrb[3].mxu1  ;;  %v527_v56 = vadd.f32 %v716_v50, %v662_v47 }
 0x102   : > { %v567_v57 = vadd.f32 %v738_v51, %v527_v56 }
 0x104   : > { %573 = vst.msk [vmem:[%s204_s13] sm:$0xf] %vm572_vm0, %v567_v57 }
 0x105 PF: > { %s15_s16 = sadd.s32 1, %s822_s16   ;;  %s989_s14 = smov %s818_s15 }
 0x106   : > { %p12_p5 = scmp.ge.s32.totalorder %s15_s16, 4   ;;  %s990_s15 = smov %s992_s2 }
 0x108   :  { %14 = sbr.rel (!%p12_p5) target bundleno = 3 (0x3), region = 62 }

</bundles_post_ra>
